<compile_context>
chip_gen: v6e
topology: v6e:2x2x1
jax: 0.10.0
libtpu: 0.0.40
codegen_flags: <defaults>
</compile_context>

<pallas_src>
import functools

import jax
import jax.numpy as jnp
import numpy as np
from jax.experimental import pallas as pl
from jax.experimental.pallas import tpu as pltpu


# ----------------------------------------------------------------------------
# Fused DownBlock kernel: one (image, row-tile) per grid step
# ----------------------------------------------------------------------------
def _down_block_kernel(x00_ref, x01_ref, x10_ref, x11_ref,
                       w1_ref, b1_ref, w2_ref, b2_ref,
                       out_ref,
                       carry10_ref, carry11_ref,
                       *, row_tile, skip):
    """Fused ConvBlock + stride-2 pool conv for one row tile of one image.

    x{r}{c}_ref : (1, Ho+1, Wo+1, Cin) row/col parity slices of the reflect-
                  padded input (whole image, resident across the row axis).
    w1_ref      : (9*Cin,  Cout)  ConvBlock weights, (kh, kw, ci) flattened.
    w2_ref      : (9*Cout, Cout)  pool-conv weights, (kh, kw, ci) flattened.
    b1/b2_ref   : (1, Cout) f32.
    out_ref     : (1, R, Wo, Cout) f32 -> pool output rows [t*R, (t+1)*R).
    carry*_ref  : (1, Wo, Cout) scratch carrying the last odd-row-parity
                  ConvBlock row of the previous row tile (pool halo).
    """
    R = row_tile
    _, _, wq, cin = x00_ref.shape
    Wo = wq - 1
    cout = w2_ref.shape[-1]
    cdt = w1_ref.dtype                       # MXU compute dtype (bf16 default)
    M = R * Wo

    t = pl.program_id(1)
    row0 = pl.multiple_of(t * R, R)

    xq = ((x00_ref, x01_ref), (x10_ref, x11_ref))

    def window(pr, pc, sr, sc):
        # contiguous (R, Wo, Cin) window of a parity buffer -> matmul-LHS rows
        return xq[pr][pc][0, pl.ds(row0 + sr, R), sc:sc + Wo, :].reshape(M, cin)

    # --- ConvBlock: single MXU matmul, K = 9*Cin, M = 4*R*Wo.  The im2col
    #     LHS lives only in VMEM and is built tap-by-tap right before the dot.
    parity_lhs = []
    for op_r in (0, 1):
        for op_c in (0, 1):
            taps = []
            for kh in range(3):
                pr, sr = (op_r + kh) % 2, (op_r + kh) // 2
                for kw in range(3):
                    pc, sc = (op_c + kw) % 2, (op_c + kw) // 2
                    taps.append(window(pr, pc, sr, sc))
            parity_lhs.append(jnp.concatenate(taps, axis=-1))      # (M, 9*Cin)
    lhs = jnp.concatenate(parity_lhs, axis=0)                      # (4M, 9*Cin)

    acc = jnp.dot(lhs, w1_ref[...], preferred_element_type=jnp.float32)
    acc = acc + b1_ref[...]                                        # bias once
    y = jnp.where(acc >= 0, acc, 0.1 * acc)                        # LeakyReLU(0.1)
    if skip:                                                       # residual (Cin == Cout)
        y = y + lhs[:, 4 * cin:5 * cin].astype(jnp.float32)        # centre tap == x
    y = y.astype(cdt)                                              # requantize for pool matmul

    y00 = y[0 * M:1 * M].reshape(R, Wo, cout)      # even rows, even cols
    y01 = y[1 * M:2 * M].reshape(R, Wo, cout)      # even rows, odd  cols
    y10 = y[2 * M:3 * M].reshape(R, Wo, cout)      # odd  rows, even cols
    y11 = y[3 * M:4 * M].reshape(R, Wo, cout)      # odd  rows, odd  cols

    # --- Row halo: pool tap kh==0 needs the odd-row-parity ConvBlock output
    #     one row above this tile.  Carried in scratch across the sequential
    #     row-tile axis; re-initialised at t == 0, which also implements the
    #     top reflect pad of the pool conv.
    @pl.when(t == 0)
    def _():
        carry10_ref[...] = y10[0:1]
        carry11_ref[...] = y11[0:1]

    c10 = carry10_ref[...]
    c11 = carry11_ref[...]
    carry10_ref[...] = y10[R - 1:R]          # halo for the next row tile
    carry11_ref[...] = y11[R - 1:R]

    if R == 1:
        y10_up, y11_up = c10, c11
    else:
        y10_up = jnp.concatenate([c10, y10[:R - 1]], axis=0)
        y11_up = jnp.concatenate([c11, y11[:R - 1]], axis=0)

    def left(a):             # left reflect pad + shift by one output column
        if Wo == 1:
            return a
        return jnp.concatenate([a[:, 0:1], a[:, :Wo - 1]], axis=1)

    # --- Pool conv: single MXU matmul, K = 9*Cout.  The nine stride-2 taps
    #     are just the (shifted) parity slices — no f32 scratch round trip.
    pool_taps = (left(y11_up), y10_up, y11_up,       # kh = 0
                 left(y01),    y00,    y01,          # kh = 1
                 left(y11),    y10,    y11)          # kh = 2
    pool_lhs = jnp.concatenate([p.reshape(M, cout) for p in pool_taps],
                               axis=-1)              # (M, 9*Cout)
    pout = jnp.dot(pool_lhs, w2_ref[...], preferred_element_type=jnp.float32)
    pout = pout + b2_ref[...]
    out_ref[0] = pout.reshape(R, Wo, cout).astype(out_ref.dtype)


# ----------------------------------------------------------------------------
# Wrapper helpers
# ----------------------------------------------------------------------------
def _largest_divisor_leq(n, target):
    r = max(1, min(int(target), int(n)))
    while n % r:
        r -= 1
    return r


def _vmem_budget_bytes(Ho, Wo, Cin, Cout, R, compute_dtype):
    it = jnp.dtype(compute_dtype).itemsize
    m = R * Wo
    est = (2 * 4 * (Ho + 1) * (Wo + 1) * Cin * it       # parity inputs (x2 buffers)
           + 2 * (9 * Cin + 9 * Cout) * Cout * it       # weights (x2 buffers)
           + 2 * R * Wo * Cout * 4                      # output block (x2 buffers)
           + 4 * m * 9 * Cin * it                       # conv1 im2col LHS
           + 4 * m * Cout * (4 + it)                    # conv1 f32 acc + requant copy
           + m * 9 * Cout * it                          # pool im2col LHS
           + m * Cout * 4)                              # pool acc
    return int(min(max(32 * 2**20, 2 * est), 64 * 2**20))


# ----------------------------------------------------------------------------
# Public wrapper: NCHW in / NCHW out (PyTorch convention)
# ----------------------------------------------------------------------------
def down_block_forward(x_nchw, params, *, compute_dtype=jnp.bfloat16,
                       row_tile=64):
    x = jnp.transpose(x_nchw, (0, 2, 3, 1))                        # -> NHWC
    N, H, W, Cin = x.shape
    Cout = params["conv_w"].shape[0]
    assert H % 2 == 0 and W % 2 == 0, "even spatial dims expected"
    Ho, Wo = H // 2, W // 2
    R = _largest_divisor_leq(Ho, row_tile)
    skip = Cin == Cout

    # Reflect pad once (cast first so the pad / parity-split passes move the
    # compute-dtype bytes), then split into four row/col parity buffers
    # (1x total bytes).  Every conv tap in the kernel is then a contiguous
    # VMEM window.
    xpad = jnp.pad(x.astype(compute_dtype), ((0, 0), (1, 1), (1, 1), (0, 0)),
                   mode="reflect")
    xparity = [xpad[:, rp::2, cp::2, :] for rp in (0, 1) for cp in (0, 1)]

    # Weights pre-flattened to matmul RHS: (kh, kw, ci) -> K.
    w1 = jnp.transpose(params["conv_w"], (2, 3, 1, 0)).reshape(9 * Cin, Cout)
    w2 = jnp.transpose(params["pool_w"], (2, 3, 1, 0)).reshape(9 * Cout, Cout)
    w1 = w1.astype(compute_dtype)
    w2 = w2.astype(compute_dtype)
    b1 = params["conv_b"].reshape(1, Cout).astype(jnp.float32)
    b2 = params["pool_b"].reshape(1, Cout).astype(jnp.float32)

    parity_spec = pl.BlockSpec((1, Ho + 1, Wo + 1, Cin),
                               lambda n, t: (n, 0, 0, 0))
    kernel = functools.partial(_down_block_kernel, row_tile=R, skip=skip)

    out = pl.pallas_call(
        kernel,
        grid=(N, Ho // R),
        in_specs=[parity_spec, parity_spec, parity_spec, parity_spec,
                  pl.BlockSpec((9 * Cin, Cout), lambda n, t: (0, 0)),
                  pl.BlockSpec((1, Cout), lambda n, t: (0, 0)),
                  pl.BlockSpec((9 * Cout, Cout), lambda n, t: (0, 0)),
                  pl.BlockSpec((1, Cout), lambda n, t: (0, 0))],
        out_specs=pl.BlockSpec((1, R, Wo, Cout), lambda n, t: (n, t, 0, 0)),
        out_shape=jax.ShapeDtypeStruct((N, Ho, Wo, Cout), jnp.float32),
        scratch_shapes=[pltpu.VMEM((1, Wo, Cout), compute_dtype),
                        pltpu.VMEM((1, Wo, Cout), compute_dtype)],
        compiler_params=pltpu.CompilerParams(
            dimension_semantics=("parallel", "arbitrary"),
            vmem_limit_bytes=_vmem_budget_bytes(Ho, Wo, Cin, Cout, R,
                                                compute_dtype)),
    )(*xparity, w1, b1, w2, b2)

    return jnp.transpose(out, (0, 3, 1, 2))                        # -> NCHW


# ----------------------------------------------------------------------------
# Pure-JAX reference (same casting points as the kernel)
# ----------------------------------------------------------------------------
def _conv_ref(z, w_oihw, b, *, stride, compute_dtype):
    zp = jnp.pad(z, ((0, 0), (1, 1), (1, 1), (0, 0)), mode="reflect")
    zp = zp.astype(compute_dtype)
    w = jnp.transpose(w_oihw, (2, 3, 1, 0)).astype(compute_dtype)
    y = jax.lax.conv_general_dilated(
        zp, w, (stride, stride), "VALID",
        dimension_numbers=("NHWC", "HWIO", "NHWC"),
        preferred_element_type=jnp.float32)
    return y + b.reshape(1, 1, 1, -1).astype(jnp.float32)


def down_block_ref(x_nchw, params, *, compute_dtype=jnp.bfloat16):
    x = jnp.transpose(x_nchw, (0, 2, 3, 1)).astype(jnp.float32)
    cin = x.shape[-1]
    cout = params["conv_w"].shape[0]
    y = _conv_ref(x, params["conv_w"], params["conv_b"],
                  stride=1, compute_dtype=compute_dtype)
    y = jnp.where(y >= 0, y, 0.1 * y)                  # LeakyReLU(0.1)
    if cin == cout:                                    # ConvBlock residual
        y = y + x.astype(compute_dtype).astype(jnp.float32)
    y = _conv_ref(y, params["pool_w"], params["pool_b"],
                  stride=2, compute_dtype=compute_dtype)
    return jnp.transpose(y, (0, 3, 1, 2))


# ----------------------------------------------------------------------------
def _make_params(key, cin, cout):
    ks = jax.random.split(key, 4)
    return {
        "conv_w": 0.1 * jax.random.normal(ks[0], (cout, cin, 3, 3), jnp.float32),
        "conv_b": 0.1 * jax.random.normal(ks[1], (cout,), jnp.float32),
        "pool_w": 0.1 * jax.random.normal(ks[2], (cout, cout, 3, 3), jnp.float32),
        "pool_b": 0.1 * jax.random.normal(ks[3], (cout,), jnp.float32),
    }


if __name__ == "__main__":
    root = jax.random.PRNGKey(0)

    def check(cin, cout, *, compute_dtype, row_tile, rtol, atol, salt):
        kp, kx = jax.random.split(jax.random.fold_in(root, salt))
        params = _make_params(kp, cin, cout)
        x = jax.random.normal(kx, (2, cin, 16, 16), jnp.float32)
        fwd = jax.jit(functools.partial(down_block_forward,
                                        compute_dtype=compute_dtype,
                                        row_tile=row_tile))
        out = jax.block_until_ready(fwd(x, params))
        ref = jax.block_until_ready(
            down_block_ref(x, params, compute_dtype=compute_dtype))
        assert out.shape == (2, cout, 8, 8), out.shape
        np.testing.assert_allclose(np.asarray(out), np.asarray(ref),
                                   rtol=rtol, atol=atol)

    # f32 compute path, 2 row tiles per image (exercises the carried halo row).
    check(4, 8, compute_dtype=jnp.float32, row_tile=4,
          rtol=1e-4, atol=1e-4, salt=0)
    # Cin == Cout -> ConvBlock residual path, single row tile.
    check(8, 8, compute_dtype=jnp.float32, row_tile=8,
          rtol=1e-4, atol=1e-4, salt=1)
    # Default bf16 fast path (MXU-native inputs, f32 accumulation), 2 tiles.
    check(4, 8, compute_dtype=jnp.bfloat16, row_tile=4,
          rtol=1e-2, atol=1e-2, salt=2)

    print("KERNEL_OK")
</pallas_src>

<mosaic_0001>
module attributes {stable_mosaic.version = 11 : i64} {
  func.func @_down_block_kernel(%arg0: i32, %arg1: i32, %arg2: memref<1x9x9x4xf32, #tpu.memory_space<vmem>>, %arg3: memref<1x9x9x4xf32, #tpu.memory_space<vmem>>, %arg4: memref<1x9x9x4xf32, #tpu.memory_space<vmem>>, %arg5: memref<1x9x9x4xf32, #tpu.memory_space<vmem>>, %arg6: memref<36x8xf32, #tpu.memory_space<vmem>>, %arg7: memref<1x8xf32, #tpu.memory_space<vmem>>, %arg8: memref<72x8xf32, #tpu.memory_space<vmem>>, %arg9: memref<1x8xf32, #tpu.memory_space<vmem>>, %arg10: memref<1x4x8x8xf32, #tpu.memory_space<vmem>>, %arg11: memref<1x8x8xf32, #tpu.memory_space<vmem>>, %arg12: memref<1x8x8xf32, #tpu.memory_space<vmem>>) attributes {dimension_semantics = [#tpu.dimension_semantics<parallel>, #tpu.dimension_semantics<arbitrary>], iteration_bounds = array<i64: 2, 2>, scalar_prefetch = 0 : i64, scratch_operands = 2 : i64, tpu.core_type = #tpu.core_type<tc>, window_params = [{transform_indices = @transform_0, window_bounds = array<i64: 1, 9, 9, 4>}, {transform_indices = @transform_1, window_bounds = array<i64: 1, 9, 9, 4>}, {transform_indices = @transform_2, window_bounds = array<i64: 1, 9, 9, 4>}, {transform_indices = @transform_3, window_bounds = array<i64: 1, 9, 9, 4>}, {pipeline_mode = #tpu.pipeline_mode<synchronous>, transform_indices = @transform_4, window_bounds = array<i64: 36, 8>}, {pipeline_mode = #tpu.pipeline_mode<synchronous>, transform_indices = @transform_5, window_bounds = array<i64: 1, 8>}, {pipeline_mode = #tpu.pipeline_mode<synchronous>, transform_indices = @transform_6, window_bounds = array<i64: 72, 8>}, {pipeline_mode = #tpu.pipeline_mode<synchronous>, transform_indices = @transform_7, window_bounds = array<i64: 1, 8>}, {transform_indices = @transform_8, window_bounds = array<i64: 1, 4, 8, 8>}]} {
    %c4_i32 = arith.constant 4 : i32
    %0 = arith.muli %arg1, %c4_i32 : i32
    %1 = tpu.assume_multiple %0, 4 : i32
    %c0_i32 = arith.constant 0 : i32
    %2 = arith.addi %1, %c0_i32 : i32
    %c0 = arith.constant 0 : index
    %3 = arith.index_cast %2 : i32 to index
    %c0_0 = arith.constant 0 : index
    %c0_1 = arith.constant 0 : index
    %4 = vector.load %arg2[%c0, %3, %c0_0, %c0_1] : memref<1x9x9x4xf32, #tpu.memory_space<vmem>>, vector<1x4x8x4xf32>
    %5 = vector.shape_cast %4 : vector<1x4x8x4xf32> to vector<4x8x4xf32>
    %6 = vector.shape_cast %5 : vector<4x8x4xf32> to vector<32x4xf32>
    %c0_i32_2 = arith.constant 0 : i32
    %7 = arith.addi %1, %c0_i32_2 : i32
    %c0_3 = arith.constant 0 : index
    %8 = arith.index_cast %7 : i32 to index
    %c0_4 = arith.constant 0 : index
    %c0_5 = arith.constant 0 : index
    %9 = vector.load %arg3[%c0_3, %8, %c0_4, %c0_5] : memref<1x9x9x4xf32, #tpu.memory_space<vmem>>, vector<1x4x8x4xf32>
    %10 = vector.shape_cast %9 : vector<1x4x8x4xf32> to vector<4x8x4xf32>
    %11 = vector.shape_cast %10 : vector<4x8x4xf32> to vector<32x4xf32>
    %c0_i32_6 = arith.constant 0 : i32
    %12 = arith.addi %1, %c0_i32_6 : i32
    %c0_7 = arith.constant 0 : index
    %13 = arith.index_cast %12 : i32 to index
    %c1 = arith.constant 1 : index
    %c0_8 = arith.constant 0 : index
    %14 = vector.load %arg2[%c0_7, %13, %c1, %c0_8] : memref<1x9x9x4xf32, #tpu.memory_space<vmem>>, vector<1x4x8x4xf32>
    %15 = vector.shape_cast %14 : vector<1x4x8x4xf32> to vector<4x8x4xf32>
    %16 = vector.shape_cast %15 : vector<4x8x4xf32> to vector<32x4xf32>
    %c0_i32_9 = arith.constant 0 : i32
    %17 = arith.addi %1, %c0_i32_9 : i32
    %c0_10 = arith.constant 0 : index
    %18 = arith.index_cast %17 : i32 to index
    %c0_11 = arith.constant 0 : index
    %c0_12 = arith.constant 0 : index
    %19 = vector.load %arg4[%c0_10, %18, %c0_11, %c0_12] : memref<1x9x9x4xf32, #tpu.memory_space<vmem>>, vector<1x4x8x4xf32>
    %20 = vector.shape_cast %19 : vector<1x4x8x4xf32> to vector<4x8x4xf32>
    %21 = vector.shape_cast %20 : vector<4x8x4xf32> to vector<32x4xf32>
    %c0_i32_13 = arith.constant 0 : i32
    %22 = arith.addi %1, %c0_i32_13 : i32
    %c0_14 = arith.constant 0 : index
    %23 = arith.index_cast %22 : i32 to index
    %c0_15 = arith.constant 0 : index
    %c0_16 = arith.constant 0 : index
    %24 = vector.load %arg5[%c0_14, %23, %c0_15, %c0_16] : memref<1x9x9x4xf32, #tpu.memory_space<vmem>>, vector<1x4x8x4xf32>
    %25 = vector.shape_cast %24 : vector<1x4x8x4xf32> to vector<4x8x4xf32>
    %26 = vector.shape_cast %25 : vector<4x8x4xf32> to vector<32x4xf32>
    %c0_i32_17 = arith.constant 0 : i32
    %27 = arith.addi %1, %c0_i32_17 : i32
    %c0_18 = arith.constant 0 : index
    %28 = arith.index_cast %27 : i32 to index
    %c1_19 = arith.constant 1 : index
    %c0_20 = arith.constant 0 : index
    %29 = vector.load %arg4[%c0_18, %28, %c1_19, %c0_20] : memref<1x9x9x4xf32, #tpu.memory_space<vmem>>, vector<1x4x8x4xf32>
    %30 = vector.shape_cast %29 : vector<1x4x8x4xf32> to vector<4x8x4xf32>
    %31 = vector.shape_cast %30 : vector<4x8x4xf32> to vector<32x4xf32>
    %c1_i32 = arith.constant 1 : i32
    %32 = arith.addi %1, %c1_i32 : i32
    %c0_21 = arith.constant 0 : index
    %33 = arith.index_cast %32 : i32 to index
    %c0_22 = arith.constant 0 : index
    %c0_23 = arith.constant 0 : index
    %34 = vector.load %arg2[%c0_21, %33, %c0_22, %c0_23] : memref<1x9x9x4xf32, #tpu.memory_space<vmem>>, vector<1x4x8x4xf32>
    %35 = vector.shape_cast %34 : vector<1x4x8x4xf32> to vector<4x8x4xf32>
    %36 = vector.shape_cast %35 : vector<4x8x4xf32> to vector<32x4xf32>
    %c1_i32_24 = arith.constant 1 : i32
    %37 = arith.addi %1, %c1_i32_24 : i32
    %c0_25 = arith.constant 0 : index
    %38 = arith.index_cast %37 : i32 to index
    %c0_26 = arith.constant 0 : index
    %c0_27 = arith.constant 0 : index
    %39 = vector.load %arg3[%c0_25, %38, %c0_26, %c0_27] : memref<1x9x9x4xf32, #tpu.memory_space<vmem>>, vector<1x4x8x4xf32>
    %40 = vector.shape_cast %39 : vector<1x4x8x4xf32> to vector<4x8x4xf32>
    %41 = vector.shape_cast %40 : vector<4x8x4xf32> to vector<32x4xf32>
    %c1_i32_28 = arith.constant 1 : i32
    %42 = arith.addi %1, %c1_i32_28 : i32
    %c0_29 = arith.constant 0 : index
    %43 = arith.index_cast %42 : i32 to index
    %c1_30 = arith.constant 1 : index
    %c0_31 = arith.constant 0 : index
    %44 = vector.load %arg2[%c0_29, %43, %c1_30, %c0_31] : memref<1x9x9x4xf32, #tpu.memory_space<vmem>>, vector<1x4x8x4xf32>
    %45 = vector.shape_cast %44 : vector<1x4x8x4xf32> to vector<4x8x4xf32>
    %46 = vector.shape_cast %45 : vector<4x8x4xf32> to vector<32x4xf32>
    %47 = tpu.concatenate %6, %11, %16, %21, %26, %31, %36, %41, %46 in 1 : vector<32x4xf32>, vector<32x4xf32>, vector<32x4xf32>, vector<32x4xf32>, vector<32x4xf32>, vector<32x4xf32>, vector<32x4xf32>, vector<32x4xf32>, vector<32x4xf32> -> vector<32x36xf32>
    %c0_i32_32 = arith.constant 0 : i32
    %48 = arith.addi %1, %c0_i32_32 : i32
    %c0_33 = arith.constant 0 : index
    %49 = arith.index_cast %48 : i32 to index
    %c0_34 = arith.constant 0 : index
    %c0_35 = arith.constant 0 : index
    %50 = vector.load %arg3[%c0_33, %49, %c0_34, %c0_35] : memref<1x9x9x4xf32, #tpu.memory_space<vmem>>, vector<1x4x8x4xf32>
    %51 = vector.shape_cast %50 : vector<1x4x8x4xf32> to vector<4x8x4xf32>
    %52 = vector.shape_cast %51 : vector<4x8x4xf32> to vector<32x4xf32>
    %c0_i32_36 = arith.constant 0 : i32
    %53 = arith.addi %1, %c0_i32_36 : i32
    %c0_37 = arith.constant 0 : index
    %54 = arith.index_cast %53 : i32 to index
    %c1_38 = arith.constant 1 : index
    %c0_39 = arith.constant 0 : index
    %55 = vector.load %arg2[%c0_37, %54, %c1_38, %c0_39] : memref<1x9x9x4xf32, #tpu.memory_space<vmem>>, vector<1x4x8x4xf32>
    %56 = vector.shape_cast %55 : vector<1x4x8x4xf32> to vector<4x8x4xf32>
    %57 = vector.shape_cast %56 : vector<4x8x4xf32> to vector<32x4xf32>
    %c0_i32_40 = arith.constant 0 : i32
    %58 = arith.addi %1, %c0_i32_40 : i32
    %c0_41 = arith.constant 0 : index
    %59 = arith.index_cast %58 : i32 to index
    %c1_42 = arith.constant 1 : index
    %c0_43 = arith.constant 0 : index
    %60 = vector.load %arg3[%c0_41, %59, %c1_42, %c0_43] : memref<1x9x9x4xf32, #tpu.memory_space<vmem>>, vector<1x4x8x4xf32>
    %61 = vector.shape_cast %60 : vector<1x4x8x4xf32> to vector<4x8x4xf32>
    %62 = vector.shape_cast %61 : vector<4x8x4xf32> to vector<32x4xf32>
    %c0_i32_44 = arith.constant 0 : i32
    %63 = arith.addi %1, %c0_i32_44 : i32
    %c0_45 = arith.constant 0 : index
    %64 = arith.index_cast %63 : i32 to index
    %c0_46 = arith.constant 0 : index
    %c0_47 = arith.constant 0 : index
    %65 = vector.load %arg5[%c0_45, %64, %c0_46, %c0_47] : memref<1x9x9x4xf32, #tpu.memory_space<vmem>>, vector<1x4x8x4xf32>
    %66 = vector.shape_cast %65 : vector<1x4x8x4xf32> to vector<4x8x4xf32>
    %67 = vector.shape_cast %66 : vector<4x8x4xf32> to vector<32x4xf32>
    %c0_i32_48 = arith.constant 0 : i32
    %68 = arith.addi %1, %c0_i32_48 : i32
    %c0_49 = arith.constant 0 : index
    %69 = arith.index_cast %68 : i32 to index
    %c1_50 = arith.constant 1 : index
    %c0_51 = arith.constant 0 : index
    %70 = vector.load %arg4[%c0_49, %69, %c1_50, %c0_51] : memref<1x9x9x4xf32, #tpu.memory_space<vmem>>, vector<1x4x8x4xf32>
    %71 = vector.shape_cast %70 : vector<1x4x8x4xf32> to vector<4x8x4xf32>
    %72 = vector.shape_cast %71 : vector<4x8x4xf32> to vector<32x4xf32>
    %c0_i32_52 = arith.constant 0 : i32
    %73 = arith.addi %1, %c0_i32_52 : i32
    %c0_53 = arith.constant 0 : index
    %74 = arith.index_cast %73 : i32 to index
    %c1_54 = arith.constant 1 : index
    %c0_55 = arith.constant 0 : index
    %75 = vector.load %arg5[%c0_53, %74, %c1_54, %c0_55] : memref<1x9x9x4xf32, #tpu.memory_space<vmem>>, vector<1x4x8x4xf32>
    %76 = vector.shape_cast %75 : vector<1x4x8x4xf32> to vector<4x8x4xf32>
    %77 = vector.shape_cast %76 : vector<4x8x4xf32> to vector<32x4xf32>
    %c1_i32_56 = arith.constant 1 : i32
    %78 = arith.addi %1, %c1_i32_56 : i32
    %c0_57 = arith.constant 0 : index
    %79 = arith.index_cast %78 : i32 to index
    %c0_58 = arith.constant 0 : index
    %c0_59 = arith.constant 0 : index
    %80 = vector.load %arg3[%c0_57, %79, %c0_58, %c0_59] : memref<1x9x9x4xf32, #tpu.memory_space<vmem>>, vector<1x4x8x4xf32>
    %81 = vector.shape_cast %80 : vector<1x4x8x4xf32> to vector<4x8x4xf32>
    %82 = vector.shape_cast %81 : vector<4x8x4xf32> to vector<32x4xf32>
    %c1_i32_60 = arith.constant 1 : i32
    %83 = arith.addi %1, %c1_i32_60 : i32
    %c0_61 = arith.constant 0 : index
    %84 = arith.index_cast %83 : i32 to index
    %c1_62 = arith.constant 1 : index
    %c0_63 = arith.constant 0 : index
    %85 = vector.load %arg2[%c0_61, %84, %c1_62, %c0_63] : memref<1x9x9x4xf32, #tpu.memory_space<vmem>>, vector<1x4x8x4xf32>
    %86 = vector.shape_cast %85 : vector<1x4x8x4xf32> to vector<4x8x4xf32>
    %87 = vector.shape_cast %86 : vector<4x8x4xf32> to vector<32x4xf32>
    %c1_i32_64 = arith.constant 1 : i32
    %88 = arith.addi %1, %c1_i32_64 : i32
    %c0_65 = arith.constant 0 : index
    %89 = arith.index_cast %88 : i32 to index
    %c1_66 = arith.constant 1 : index
    %c0_67 = arith.constant 0 : index
    %90 = vector.load %arg3[%c0_65, %89, %c1_66, %c0_67] : memref<1x9x9x4xf32, #tpu.memory_space<vmem>>, vector<1x4x8x4xf32>
    %91 = vector.shape_cast %90 : vector<1x4x8x4xf32> to vector<4x8x4xf32>
    %92 = vector.shape_cast %91 : vector<4x8x4xf32> to vector<32x4xf32>
    %93 = tpu.concatenate %52, %57, %62, %67, %72, %77, %82, %87, %92 in 1 : vector<32x4xf32>, vector<32x4xf32>, vector<32x4xf32>, vector<32x4xf32>, vector<32x4xf32>, vector<32x4xf32>, vector<32x4xf32>, vector<32x4xf32>, vector<32x4xf32> -> vector<32x36xf32>
    %c0_i32_68 = arith.constant 0 : i32
    %94 = arith.addi %1, %c0_i32_68 : i32
    %c0_69 = arith.constant 0 : index
    %95 = arith.index_cast %94 : i32 to index
    %c0_70 = arith.constant 0 : index
    %c0_71 = arith.constant 0 : index
    %96 = vector.load %arg4[%c0_69, %95, %c0_70, %c0_71] : memref<1x9x9x4xf32, #tpu.memory_space<vmem>>, vector<1x4x8x4xf32>
    %97 = vector.shape_cast %96 : vector<1x4x8x4xf32> to vector<4x8x4xf32>
    %98 = vector.shape_cast %97 : vector<4x8x4xf32> to vector<32x4xf32>
    %c0_i32_72 = arith.constant 0 : i32
    %99 = arith.addi %1, %c0_i32_72 : i32
    %c0_73 = arith.constant 0 : index
    %100 = arith.index_cast %99 : i32 to index
    %c0_74 = arith.constant 0 : index
    %c0_75 = arith.constant 0 : index
    %101 = vector.load %arg5[%c0_73, %100, %c0_74, %c0_75] : memref<1x9x9x4xf32, #tpu.memory_space<vmem>>, vector<1x4x8x4xf32>
    %102 = vector.shape_cast %101 : vector<1x4x8x4xf32> to vector<4x8x4xf32>
    %103 = vector.shape_cast %102 : vector<4x8x4xf32> to vector<32x4xf32>
    %c0_i32_76 = arith.constant 0 : i32
    %104 = arith.addi %1, %c0_i32_76 : i32
    %c0_77 = arith.constant 0 : index
    %105 = arith.index_cast %104 : i32 to index
    %c1_78 = arith.constant 1 : index
    %c0_79 = arith.constant 0 : index
    %106 = vector.load %arg4[%c0_77, %105, %c1_78, %c0_79] : memref<1x9x9x4xf32, #tpu.memory_space<vmem>>, vector<1x4x8x4xf32>
    %107 = vector.shape_cast %106 : vector<1x4x8x4xf32> to vector<4x8x4xf32>
    %108 = vector.shape_cast %107 : vector<4x8x4xf32> to vector<32x4xf32>
    %c1_i32_80 = arith.constant 1 : i32
    %109 = arith.addi %1, %c1_i32_80 : i32
    %c0_81 = arith.constant 0 : index
    %110 = arith.index_cast %109 : i32 to index
    %c0_82 = arith.constant 0 : index
    %c0_83 = arith.constant 0 : index
    %111 = vector.load %arg2[%c0_81, %110, %c0_82, %c0_83] : memref<1x9x9x4xf32, #tpu.memory_space<vmem>>, vector<1x4x8x4xf32>
    %112 = vector.shape_cast %111 : vector<1x4x8x4xf32> to vector<4x8x4xf32>
    %113 = vector.shape_cast %112 : vector<4x8x4xf32> to vector<32x4xf32>
    %c1_i32_84 = arith.constant 1 : i32
    %114 = arith.addi %1, %c1_i32_84 : i32
    %c0_85 = arith.constant 0 : index
    %115 = arith.index_cast %114 : i32 to index
    %c0_86 = arith.constant 0 : index
    %c0_87 = arith.constant 0 : index
    %116 = vector.load %arg3[%c0_85, %115, %c0_86, %c0_87] : memref<1x9x9x4xf32, #tpu.memory_space<vmem>>, vector<1x4x8x4xf32>
    %117 = vector.shape_cast %116 : vector<1x4x8x4xf32> to vector<4x8x4xf32>
    %118 = vector.shape_cast %117 : vector<4x8x4xf32> to vector<32x4xf32>
    %c1_i32_88 = arith.constant 1 : i32
    %119 = arith.addi %1, %c1_i32_88 : i32
    %c0_89 = arith.constant 0 : index
    %120 = arith.index_cast %119 : i32 to index
    %c1_90 = arith.constant 1 : index
    %c0_91 = arith.constant 0 : index
    %121 = vector.load %arg2[%c0_89, %120, %c1_90, %c0_91] : memref<1x9x9x4xf32, #tpu.memory_space<vmem>>, vector<1x4x8x4xf32>
    %122 = vector.shape_cast %121 : vector<1x4x8x4xf32> to vector<4x8x4xf32>
    %123 = vector.shape_cast %122 : vector<4x8x4xf32> to vector<32x4xf32>
    %c1_i32_92 = arith.constant 1 : i32
    %124 = arith.addi %1, %c1_i32_92 : i32
    %c0_93 = arith.constant 0 : index
    %125 = arith.index_cast %124 : i32 to index
    %c0_94 = arith.constant 0 : index
    %c0_95 = arith.constant 0 : index
    %126 = vector.load %arg4[%c0_93, %125, %c0_94, %c0_95] : memref<1x9x9x4xf32, #tpu.memory_space<vmem>>, vector<1x4x8x4xf32>
    %127 = vector.shape_cast %126 : vector<1x4x8x4xf32> to vector<4x8x4xf32>
    %128 = vector.shape_cast %127 : vector<4x8x4xf32> to vector<32x4xf32>
    %c1_i32_96 = arith.constant 1 : i32
    %129 = arith.addi %1, %c1_i32_96 : i32
    %c0_97 = arith.constant 0 : index
    %130 = arith.index_cast %129 : i32 to index
    %c0_98 = arith.constant 0 : index
    %c0_99 = arith.constant 0 : index
    %131 = vector.load %arg5[%c0_97, %130, %c0_98, %c0_99] : memref<1x9x9x4xf32, #tpu.memory_space<vmem>>, vector<1x4x8x4xf32>
    %132 = vector.shape_cast %131 : vector<1x4x8x4xf32> to vector<4x8x4xf32>
    %133 = vector.shape_cast %132 : vector<4x8x4xf32> to vector<32x4xf32>
    %c1_i32_100 = arith.constant 1 : i32
    %134 = arith.addi %1, %c1_i32_100 : i32
    %c0_101 = arith.constant 0 : index
    %135 = arith.index_cast %134 : i32 to index
    %c1_102 = arith.constant 1 : index
    %c0_103 = arith.constant 0 : index
    %136 = vector.load %arg4[%c0_101, %135, %c1_102, %c0_103] : memref<1x9x9x4xf32, #tpu.memory_space<vmem>>, vector<1x4x8x4xf32>
    %137 = vector.shape_cast %136 : vector<1x4x8x4xf32> to vector<4x8x4xf32>
    %138 = vector.shape_cast %137 : vector<4x8x4xf32> to vector<32x4xf32>
    %139 = tpu.concatenate %98, %103, %108, %113, %118, %123, %128, %133, %138 in 1 : vector<32x4xf32>, vector<32x4xf32>, vector<32x4xf32>, vector<32x4xf32>, vector<32x4xf32>, vector<32x4xf32>, vector<32x4xf32>, vector<32x4xf32>, vector<32x4xf32> -> vector<32x36xf32>
    %c0_i32_104 = arith.constant 0 : i32
    %140 = arith.addi %1, %c0_i32_104 : i32
    %c0_105 = arith.constant 0 : index
    %141 = arith.index_cast %140 : i32 to index
    %c0_106 = arith.constant 0 : index
    %c0_107 = arith.constant 0 : index
    %142 = vector.load %arg5[%c0_105, %141, %c0_106, %c0_107] : memref<1x9x9x4xf32, #tpu.memory_space<vmem>>, vector<1x4x8x4xf32>
    %143 = vector.shape_cast %142 : vector<1x4x8x4xf32> to vector<4x8x4xf32>
    %144 = vector.shape_cast %143 : vector<4x8x4xf32> to vector<32x4xf32>
    %c0_i32_108 = arith.constant 0 : i32
    %145 = arith.addi %1, %c0_i32_108 : i32
    %c0_109 = arith.constant 0 : index
    %146 = arith.index_cast %145 : i32 to index
    %c1_110 = arith.constant 1 : index
    %c0_111 = arith.constant 0 : index
    %147 = vector.load %arg4[%c0_109, %146, %c1_110, %c0_111] : memref<1x9x9x4xf32, #tpu.memory_space<vmem>>, vector<1x4x8x4xf32>
    %148 = vector.shape_cast %147 : vector<1x4x8x4xf32> to vector<4x8x4xf32>
    %149 = vector.shape_cast %148 : vector<4x8x4xf32> to vector<32x4xf32>
    %c0_i32_112 = arith.constant 0 : i32
    %150 = arith.addi %1, %c0_i32_112 : i32
    %c0_113 = arith.constant 0 : index
    %151 = arith.index_cast %150 : i32 to index
    %c1_114 = arith.constant 1 : index
    %c0_115 = arith.constant 0 : index
    %152 = vector.load %arg5[%c0_113, %151, %c1_114, %c0_115] : memref<1x9x9x4xf32, #tpu.memory_space<vmem>>, vector<1x4x8x4xf32>
    %153 = vector.shape_cast %152 : vector<1x4x8x4xf32> to vector<4x8x4xf32>
    %154 = vector.shape_cast %153 : vector<4x8x4xf32> to vector<32x4xf32>
    %c1_i32_116 = arith.constant 1 : i32
    %155 = arith.addi %1, %c1_i32_116 : i32
    %c0_117 = arith.constant 0 : index
    %156 = arith.index_cast %155 : i32 to index
    %c0_118 = arith.constant 0 : index
    %c0_119 = arith.constant 0 : index
    %157 = vector.load %arg3[%c0_117, %156, %c0_118, %c0_119] : memref<1x9x9x4xf32, #tpu.memory_space<vmem>>, vector<1x4x8x4xf32>
    %158 = vector.shape_cast %157 : vector<1x4x8x4xf32> to vector<4x8x4xf32>
    %159 = vector.shape_cast %158 : vector<4x8x4xf32> to vector<32x4xf32>
    %c1_i32_120 = arith.constant 1 : i32
    %160 = arith.addi %1, %c1_i32_120 : i32
    %c0_121 = arith.constant 0 : index
    %161 = arith.index_cast %160 : i32 to index
    %c1_122 = arith.constant 1 : index
    %c0_123 = arith.constant 0 : index
    %162 = vector.load %arg2[%c0_121, %161, %c1_122, %c0_123] : memref<1x9x9x4xf32, #tpu.memory_space<vmem>>, vector<1x4x8x4xf32>
    %163 = vector.shape_cast %162 : vector<1x4x8x4xf32> to vector<4x8x4xf32>
    %164 = vector.shape_cast %163 : vector<4x8x4xf32> to vector<32x4xf32>
    %c1_i32_124 = arith.constant 1 : i32
    %165 = arith.addi %1, %c1_i32_124 : i32
    %c0_125 = arith.constant 0 : index
    %166 = arith.index_cast %165 : i32 to index
    %c1_126 = arith.constant 1 : index
    %c0_127 = arith.constant 0 : index
    %167 = vector.load %arg3[%c0_125, %166, %c1_126, %c0_127] : memref<1x9x9x4xf32, #tpu.memory_space<vmem>>, vector<1x4x8x4xf32>
    %168 = vector.shape_cast %167 : vector<1x4x8x4xf32> to vector<4x8x4xf32>
    %169 = vector.shape_cast %168 : vector<4x8x4xf32> to vector<32x4xf32>
    %c1_i32_128 = arith.constant 1 : i32
    %170 = arith.addi %1, %c1_i32_128 : i32
    %c0_129 = arith.constant 0 : index
    %171 = arith.index_cast %170 : i32 to index
    %c0_130 = arith.constant 0 : index
    %c0_131 = arith.constant 0 : index
    %172 = vector.load %arg5[%c0_129, %171, %c0_130, %c0_131] : memref<1x9x9x4xf32, #tpu.memory_space<vmem>>, vector<1x4x8x4xf32>
    %173 = vector.shape_cast %172 : vector<1x4x8x4xf32> to vector<4x8x4xf32>
    %174 = vector.shape_cast %173 : vector<4x8x4xf32> to vector<32x4xf32>
    %c1_i32_132 = arith.constant 1 : i32
    %175 = arith.addi %1, %c1_i32_132 : i32
    %c0_133 = arith.constant 0 : index
    %176 = arith.index_cast %175 : i32 to index
    %c1_134 = arith.constant 1 : index
    %c0_135 = arith.constant 0 : index
    %177 = vector.load %arg4[%c0_133, %176, %c1_134, %c0_135] : memref<1x9x9x4xf32, #tpu.memory_space<vmem>>, vector<1x4x8x4xf32>
    %178 = vector.shape_cast %177 : vector<1x4x8x4xf32> to vector<4x8x4xf32>
    %179 = vector.shape_cast %178 : vector<4x8x4xf32> to vector<32x4xf32>
    %c1_i32_136 = arith.constant 1 : i32
    %180 = arith.addi %1, %c1_i32_136 : i32
    %c0_137 = arith.constant 0 : index
    %181 = arith.index_cast %180 : i32 to index
    %c1_138 = arith.constant 1 : index
    %c0_139 = arith.constant 0 : index
    %182 = vector.load %arg5[%c0_137, %181, %c1_138, %c0_139] : memref<1x9x9x4xf32, #tpu.memory_space<vmem>>, vector<1x4x8x4xf32>
    %183 = vector.shape_cast %182 : vector<1x4x8x4xf32> to vector<4x8x4xf32>
    %184 = vector.shape_cast %183 : vector<4x8x4xf32> to vector<32x4xf32>
    %185 = tpu.concatenate %144, %149, %154, %159, %164, %169, %174, %179, %184 in 1 : vector<32x4xf32>, vector<32x4xf32>, vector<32x4xf32>, vector<32x4xf32>, vector<32x4xf32>, vector<32x4xf32>, vector<32x4xf32>, vector<32x4xf32>, vector<32x4xf32> -> vector<32x36xf32>
    %186 = tpu.concatenate %47, %93, %139, %185 in 0 : vector<32x36xf32>, vector<32x36xf32>, vector<32x36xf32>, vector<32x36xf32> -> vector<128x36xf32>
    %c0_140 = arith.constant 0 : index
    %c0_141 = arith.constant 0 : index
    %187 = vector.load %arg6[%c0_140, %c0_141] : memref<36x8xf32, #tpu.memory_space<vmem>>, vector<36x8xf32>
    %cst = arith.constant dense<0.000000e+00> : vector<128x8xf32>
    %188 = tpu.matmul %186, %187, %cst {dimension_numbers = #tpu.dot_dimension_numbers<[1], [0], [0], [1], [0, 0, 1, 1], [], []>} : vector<128x36xf32>, vector<36x8xf32>, vector<128x8xf32> -> vector<128x8xf32>
    %c0_142 = arith.constant 0 : index
    %c0_143 = arith.constant 0 : index
    %189 = vector.load %arg7[%c0_142, %c0_143] : memref<1x8xf32, #tpu.memory_space<vmem>>, vector<1x8xf32>
    %190 = vector.broadcast %189 : vector<1x8xf32> to vector<128x8xf32>
    %191 = arith.addf %188, %190 : vector<128x8xf32>
    %cst_144 = arith.constant 0.000000e+00 : f32
    %192 = vector.broadcast %cst_144 : f32 to vector<128x8xf32>
    %193 = arith.cmpf oge, %191, %192 : vector<128x8xf32>
    %cst_145 = arith.constant 1.000000e-01 : f32
    %194 = vector.broadcast %cst_145 : f32 to vector<128x8xf32>
    %195 = arith.mulf %194, %191 : vector<128x8xf32>
    %196 = arith.select %193, %191, %195 : vector<128x8xi1>, vector<128x8xf32>
    %197 = vector.extract_strided_slice %196 {offsets = [0, 0], sizes = [32, 8], strides = [1, 1]} : vector<128x8xf32> to vector<32x8xf32>
    %198 = vector.shape_cast %197 : vector<32x8xf32> to vector<4x8x8xf32>
    %199 = vector.extract_strided_slice %196 {offsets = [32, 0], sizes = [32, 8], strides = [1, 1]} : vector<128x8xf32> to vector<32x8xf32>
    %200 = vector.shape_cast %199 : vector<32x8xf32> to vector<4x8x8xf32>
    %201 = vector.extract_strided_slice %196 {offsets = [64, 0], sizes = [32, 8], strides = [1, 1]} : vector<128x8xf32> to vector<32x8xf32>
    %202 = vector.shape_cast %201 : vector<32x8xf32> to vector<4x8x8xf32>
    %203 = vector.extract_strided_slice %196 {offsets = [96, 0], sizes = [32, 8], strides = [1, 1]} : vector<128x8xf32> to vector<32x8xf32>
    %204 = vector.shape_cast %203 : vector<32x8xf32> to vector<4x8x8xf32>
    %c0_i32_146 = arith.constant 0 : i32
    %205 = arith.cmpi eq, %arg1, %c0_i32_146 : i32
    %206 = arith.extui %205 : i1 to i32
    %c0_i32_147 = arith.constant 0 : i32
    %207 = arith.cmpi ne, %206, %c0_i32_147 : i32
    scf.if %207 {
      %246 = vector.extract_strided_slice %202 {offsets = [0, 0, 0], sizes = [1, 8, 8], strides = [1, 1, 1]} : vector<4x8x8xf32> to vector<1x8x8xf32>
      %c0_169 = arith.constant 0 : index
      %c0_170 = arith.constant 0 : index
      %c0_171 = arith.constant 0 : index
      %247 = vector.load %arg11[%c0_169, %c0_170, %c0_171] : memref<1x8x8xf32, #tpu.memory_space<vmem>>, vector<1x8x8xf32>
      tpu.vector_store %arg11[%c0_169, %c0_170, %c0_171], %246 {strides = array<i32>} : memref<1x8x8xf32, #tpu.memory_space<vmem>>, vector<1x8x8xf32>,
      %248 = vector.extract_strided_slice %204 {offsets = [0, 0, 0], sizes = [1, 8, 8], strides = [1, 1, 1]} : vector<4x8x8xf32> to vector<1x8x8xf32>
      %c0_172 = arith.constant 0 : index
      %c0_173 = arith.constant 0 : index
      %c0_174 = arith.constant 0 : index
      %249 = vector.load %arg12[%c0_172, %c0_173, %c0_174] : memref<1x8x8xf32, #tpu.memory_space<vmem>>, vector<1x8x8xf32>
      tpu.vector_store %arg12[%c0_172, %c0_173, %c0_174], %248 {strides = array<i32>} : memref<1x8x8xf32, #tpu.memory_space<vmem>>, vector<1x8x8xf32>,
    } else {
    }
    %c0_148 = arith.constant 0 : index
    %c0_149 = arith.constant 0 : index
    %c0_150 = arith.constant 0 : index
    %208 = vector.load %arg11[%c0_148, %c0_149, %c0_150] : memref<1x8x8xf32, #tpu.memory_space<vmem>>, vector<1x8x8xf32>
    %c0_151 = arith.constant 0 : index
    %c0_152 = arith.constant 0 : index
    %c0_153 = arith.constant 0 : index
    %209 = vector.load %arg12[%c0_151, %c0_152, %c0_153] : memref<1x8x8xf32, #tpu.memory_space<vmem>>, vector<1x8x8xf32>
    %210 = vector.extract_strided_slice %202 {offsets = [3, 0, 0], sizes = [1, 8, 8], strides = [1, 1, 1]} : vector<4x8x8xf32> to vector<1x8x8xf32>
    %c0_154 = arith.constant 0 : index
    %c0_155 = arith.constant 0 : index
    %c0_156 = arith.constant 0 : index
    %211 = vector.load %arg11[%c0_154, %c0_155, %c0_156] : memref<1x8x8xf32, #tpu.memory_space<vmem>>, vector<1x8x8xf32>
    tpu.vector_store %arg11[%c0_154, %c0_155, %c0_156], %210 {strides = array<i32>} : memref<1x8x8xf32, #tpu.memory_space<vmem>>, vector<1x8x8xf32>,
    %212 = vector.extract_strided_slice %204 {offsets = [3, 0, 0], sizes = [1, 8, 8], strides = [1, 1, 1]} : vector<4x8x8xf32> to vector<1x8x8xf32>
    %c0_157 = arith.constant 0 : index
    %c0_158 = arith.constant 0 : index
    %c0_159 = arith.constant 0 : index
    %213 = vector.load %arg12[%c0_157, %c0_158, %c0_159] : memref<1x8x8xf32, #tpu.memory_space<vmem>>, vector<1x8x8xf32>
    tpu.vector_store %arg12[%c0_157, %c0_158, %c0_159], %212 {strides = array<i32>} : memref<1x8x8xf32, #tpu.memory_space<vmem>>, vector<1x8x8xf32>,
    %214 = vector.extract_strided_slice %202 {offsets = [0, 0, 0], sizes = [3, 8, 8], strides = [1, 1, 1]} : vector<4x8x8xf32> to vector<3x8x8xf32>
    %215 = tpu.concatenate %208, %214 in 0 : vector<1x8x8xf32>, vector<3x8x8xf32> -> vector<4x8x8xf32>
    %216 = vector.extract_strided_slice %204 {offsets = [0, 0, 0], sizes = [3, 8, 8], strides = [1, 1, 1]} : vector<4x8x8xf32> to vector<3x8x8xf32>
    %217 = tpu.concatenate %209, %216 in 0 : vector<1x8x8xf32>, vector<3x8x8xf32> -> vector<4x8x8xf32>
    %218 = vector.extract_strided_slice %217 {offsets = [0, 0, 0], sizes = [4, 1, 8], strides = [1, 1, 1]} : vector<4x8x8xf32> to vector<4x1x8xf32>
    %219 = vector.extract_strided_slice %217 {offsets = [0, 0, 0], sizes = [4, 7, 8], strides = [1, 1, 1]} : vector<4x8x8xf32> to vector<4x7x8xf32>
    %220 = tpu.concatenate %218, %219 in 1 : vector<4x1x8xf32>, vector<4x7x8xf32> -> vector<4x8x8xf32>
    %221 = vector.extract_strided_slice %200 {offsets = [0, 0, 0], sizes = [4, 1, 8], strides = [1, 1, 1]} : vector<4x8x8xf32> to vector<4x1x8xf32>
    %222 = vector.extract_strided_slice %200 {offsets = [0, 0, 0], sizes = [4, 7, 8], strides = [1, 1, 1]} : vector<4x8x8xf32> to vector<4x7x8xf32>
    %223 = tpu.concatenate %221, %222 in 1 : vector<4x1x8xf32>, vector<4x7x8xf32> -> vector<4x8x8xf32>
    %224 = vector.extract_strided_slice %204 {offsets = [0, 0, 0], sizes = [4, 1, 8], strides = [1, 1, 1]} : vector<4x8x8xf32> to vector<4x1x8xf32>
    %225 = vector.extract_strided_slice %204 {offsets = [0, 0, 0], sizes = [4, 7, 8], strides = [1, 1, 1]} : vector<4x8x8xf32> to vector<4x7x8xf32>
    %226 = tpu.concatenate %224, %225 in 1 : vector<4x1x8xf32>, vector<4x7x8xf32> -> vector<4x8x8xf32>
    %227 = vector.shape_cast %220 : vector<4x8x8xf32> to vector<32x8xf32>
    %228 = vector.shape_cast %215 : vector<4x8x8xf32> to vector<32x8xf32>
    %229 = vector.shape_cast %217 : vector<4x8x8xf32> to vector<32x8xf32>
    %230 = vector.shape_cast %223 : vector<4x8x8xf32> to vector<32x8xf32>
    %231 = vector.shape_cast %198 : vector<4x8x8xf32> to vector<32x8xf32>
    %232 = vector.shape_cast %200 : vector<4x8x8xf32> to vector<32x8xf32>
    %233 = vector.shape_cast %226 : vector<4x8x8xf32> to vector<32x8xf32>
    %234 = vector.shape_cast %202 : vector<4x8x8xf32> to vector<32x8xf32>
    %235 = vector.shape_cast %204 : vector<4x8x8xf32> to vector<32x8xf32>
    %236 = tpu.concatenate %227, %228, %229, %230, %231, %232, %233, %234, %235 in 1 : vector<32x8xf32>, vector<32x8xf32>, vector<32x8xf32>, vector<32x8xf32>, vector<32x8xf32>, vector<32x8xf32>, vector<32x8xf32>, vector<32x8xf32>, vector<32x8xf32> -> vector<32x72xf32>
    %c0_160 = arith.constant 0 : index
    %c0_161 = arith.constant 0 : index
    %237 = vector.load %arg8[%c0_160, %c0_161] : memref<72x8xf32, #tpu.memory_space<vmem>>, vector<72x8xf32>
    %cst_162 = arith.constant dense<0.000000e+00> : vector<32x8xf32>
    %238 = tpu.matmul %236, %237, %cst_162 {dimension_numbers = #tpu.dot_dimension_numbers<[1], [0], [0], [1], [0, 0, 1, 1], [], []>} : vector<32x72xf32>, vector<72x8xf32>, vector<32x8xf32> -> vector<32x8xf32>
    %c0_163 = arith.constant 0 : index
    %c0_164 = arith.constant 0 : index
    %239 = vector.load %arg9[%c0_163, %c0_164] : memref<1x8xf32, #tpu.memory_space<vmem>>, vector<1x8xf32>
    %240 = vector.broadcast %239 : vector<1x8xf32> to vector<32x8xf32>
    %241 = arith.addf %238, %240 : vector<32x8xf32>
    %242 = vector.shape_cast %241 : vector<32x8xf32> to vector<4x8x8xf32>
    %c0_165 = arith.constant 0 : index
    %c0_166 = arith.constant 0 : index
    %c0_167 = arith.constant 0 : index
    %c0_168 = arith.constant 0 : index
    %243 = vector.load %arg10[%c0_165, %c0_166, %c0_167, %c0_168] : memref<1x4x8x8xf32, #tpu.memory_space<vmem>>, vector<1x4x8x8xf32>
    %244 = vector.shape_cast %243 : vector<1x4x8x8xf32> to vector<4x8x8xf32>
    %245 = vector.shape_cast %242 : vector<4x8x8xf32> to vector<1x4x8x8xf32>
    tpu.vector_store %arg10[%c0_165, %c0_166, %c0_167, %c0_168], %245 {strides = array<i32>} : memref<1x4x8x8xf32, #tpu.memory_space<vmem>>, vector<1x4x8x8xf32>,
    return
  }
  func.func @transform_0(%arg0: i32, %arg1: i32) -> (i32, i32, i32, i32) {
    %c0_i32 = arith.constant 0 : i32
    %c0_i32_0 = arith.constant 0 : i32
    %c0_i32_1 = arith.constant 0 : i32
    %c0_i32_2 = arith.constant 0 : i32
    return %arg0, %c0_i32, %c0_i32_0, %c0_i32_1 : i32, i32, i32, i32
  }
  func.func @transform_1(%arg0: i32, %arg1: i32) -> (i32, i32, i32, i32) {
    %c0_i32 = arith.constant 0 : i32
    %c0_i32_0 = arith.constant 0 : i32
    %c0_i32_1 = arith.constant 0 : i32
    %c0_i32_2 = arith.constant 0 : i32
    return %arg0, %c0_i32, %c0_i32_0, %c0_i32_1 : i32, i32, i32, i32
  }
  func.func @transform_2(%arg0: i32, %arg1: i32) -> (i32, i32, i32, i32) {
    %c0_i32 = arith.constant 0 : i32
    %c0_i32_0 = arith.constant 0 : i32
    %c0_i32_1 = arith.constant 0 : i32
    %c0_i32_2 = arith.constant 0 : i32
    return %arg0, %c0_i32, %c0_i32_0, %c0_i32_1 : i32, i32, i32, i32
  }
  func.func @transform_3(%arg0: i32, %arg1: i32) -> (i32, i32, i32, i32) {
    %c0_i32 = arith.constant 0 : i32
    %c0_i32_0 = arith.constant 0 : i32
    %c0_i32_1 = arith.constant 0 : i32
    %c0_i32_2 = arith.constant 0 : i32
    return %arg0, %c0_i32, %c0_i32_0, %c0_i32_1 : i32, i32, i32, i32
  }
  func.func @transform_4(%arg0: i32, %arg1: i32) -> (i32, i32) {
    %c0_i32 = arith.constant 0 : i32
    %c0_i32_0 = arith.constant 0 : i32
    %c0_i32_1 = arith.constant 0 : i32
    return %c0_i32, %c0_i32_0 : i32, i32
  }
  func.func @transform_5(%arg0: i32, %arg1: i32) -> (i32, i32) {
    %c0_i32 = arith.constant 0 : i32
    %c0_i32_0 = arith.constant 0 : i32
    %c0_i32_1 = arith.constant 0 : i32
    return %c0_i32, %c0_i32_0 : i32, i32
  }
  func.func @transform_6(%arg0: i32, %arg1: i32) -> (i32, i32) {
    %c0_i32 = arith.constant 0 : i32
    %c0_i32_0 = arith.constant 0 : i32
    %c0_i32_1 = arith.constant 0 : i32
    return %c0_i32, %c0_i32_0 : i32, i32
  }
  func.func @transform_7(%arg0: i32, %arg1: i32) -> (i32, i32) {
    %c0_i32 = arith.constant 0 : i32
    %c0_i32_0 = arith.constant 0 : i32
    %c0_i32_1 = arith.constant 0 : i32
    return %c0_i32, %c0_i32_0 : i32, i32
  }
  func.func @transform_8(%arg0: i32, %arg1: i32) -> (i32, i32, i32, i32) {
    %c0_i32 = arith.constant 0 : i32
    %c0_i32_0 = arith.constant 0 : i32
    %c0_i32_1 = arith.constant 0 : i32
    return %arg0, %arg1, %c0_i32, %c0_i32_0 : i32, i32, i32, i32
  }
}

</mosaic_0001>

<bundles_post_ra>
// kernel: down_block_forward.1
= control target key start
LH: loop header
LB: loop body
LE: loop exit
PB: predicated region body
PF: predicated region fallthrough
CT: control target
= control target key end

     0   :  { %s2088_s27 = smov 0   ;;  %s2090_s28 = smov 0   ;;  %s2964_s0 = inlined_call_operand.vmem [shape: f32[2,9,9,4], index: 0, kind: input, shape index: {}]   ;;  %s2965_s1 = inlined_call_operand.vmem [shape: f32[2,9,9,4], index: 1, kind: input, shape index: {}]   ;;  %s2966_s2 = inlined_call_operand.vmem [shape: f32[2,9,9,4], index: 2, kind: input, shape index: {}]   ;;  %s2967_s3 = inlined_call_operand.vmem [shape: f32[2,9,9,4], index: 3, kind: input, shape index: {}]   ;;  %s2968_s4 = inlined_call_operand.vmem [shape: f32[36,8], index: 4, kind: input, shape index: {}]   ;;  %s2969_s5 = inlined_call_operand.vmem [shape: f32[1,8], index: 5, kind: input, shape index: {}]   ;;  %s2970_s6 = inlined_call_operand.vmem [shape: f32[72,8], index: 6, kind: input, shape index: {}]   ;;  %s2971_s7 = inlined_call_operand.vmem [shape: f32[1,8], index: 7, kind: input, shape index: {}]   ;;  %s2972_s8 = inlined_call_operand.vmem [shape: f32[2,8,8,8], index: 8, kind: output, shape index: {}]  }
   0x1   :  { %s2092_s29 = smov 0   ;;  %s2094_s30 = smov 0  }
   0x2   :  { %s2096_s9 = smov 0  }
   0x3 LB: > { %s27_s10 = sadd.s32 1, %s2021_s29  ;;  %s30_s11 = sadd.s32 1, %s2025_s30  ;;  %s2029_s9 = sphi %s2096_s9, %s18_s9   ;;  %s2025_s30 = sphi %s2094_s30, %s2976_s30   ;;  %s2021_s29 = sphi %s2092_s29, %s2975_s29   ;;  %s2017_s28 = sphi %s2090_s28, %s2974_s28   ;;  %s2013_s27 = sphi %s2088_s27, %s2973_s27  }
   0x4   : > { %p28_p0 = scmp.ge.s32.totalorder %s27_s10, 2  ;;  %p1765_p1 = scmp.ge.s32.totalorder %s2029_s9, 1 }
   0x5   : > { %p306_p2 = scmp.lt.s32.totalorder %s2029_s9, 5 }
   0x6   : > { %s2978_s10 = smov (%p28_p0, %s27_s10), 0  ;;  %s2980_s11 = smov (!%p28_p0, %s30_s11), %s2025_s30 }
   0x7   : > { %p307_p3 = pnand %p1765_p1, %p306_p2  ;;  %p32_p4 = scmp.ge.s32.totalorder %s2980_s11, 2 }
   0x8   : > { %p359_p5 = scmp.lt.s32.totalorder (!%p307_p3), %s2017_s28, 1  ;;  %s1770_s12 = sshll.u32 (!%p307_p3), %s2013_s27, 2 }
   0x9   : > { %s2982_s11 = smov (%p32_p4, %s2980_s11), 0  ;;  %310 = sbr.rel (%p307_p3) target bundleno = 973 (0x3cd), region = 52 }
   0xa   : > { %p382_p6 = scmp.lt.s32.totalorder (!%p307_p3), %s1770_s12, 7  ;;  %s1841_s13 = sshll.u32 (!%p307_p3), %s2013_s27, 6 }
   0xb   : > { %s2037_s22 = smov (!%p307_p3), 28   ;;  %p1833_p7 = scmp.ne.s32.totalorder (!%p307_p3), %s2013_s27, 0 }
   0xe   : > { %s2984_s28 = smov (!%p359_p5, %s2017_s28), 1  ;;  %s2986_s12 = smov (!%p382_p6, %s1770_s12), 7  ;;  %v1049_v15 = vld [vmem:[%s2968_s4 + $0x20] sm:$0xf]  ;;  %vm1106_vm0 = vcmask 1043456   ;;  %v1048_v17 = vld [vmem:[%s2968_s4 + $0x18] sm:$0xff] }
   0xf   : > { %s1938_s14 = smul.u32 144, %s2984_s28  ;;  %s1771_s15 = sshll.u32 %s2984_s28, 3  ;;  %1880 = vmatprep.subr.msk.mxu0 %vm1106_vm0, %v1049_v15  ;;  %v1047_v19 = vld [vmem:[%s2968_s4 + $0x10] sm:$0xff]  ;;  %v1046_v21 = vld [vmem:[%s2968_s4 + $0x8] sm:$0xff]  ;;  %v1045_v22 = vld [vmem:[%s2968_s4] sm:$0xff]  ;;  %vm563_vm1 = vcmask 31744  }
  0x10   : > { %s385_s16 = sadd.s32 %s1771_s15, %s2986_s12  ;;  %s2031_s12 = smov 4   ;;  %1881 = vmatpush3.msk.msra.mxu0 %vm1106_vm0, %v1049_v15  ;;  %vm568_vm2 = vcmask 64512   ;;  %vm573_vm3 = vcmask 97280   ;;  %vm578_vm4 = vcmask 130048   ;;  %vm583_vm5 = vcmask 162816  }
  0x11   : > { %s368_s19 = scalar_lea.vmem %s2965_s1, %s1938_s14  ;;  %s1772_s20 = sshll.u32 %s385_s16, 3  ;;  %1882 = vmatprep.subr.mxu0 %v1048_v17  ;;  %vm588_vm6 = vcmask 195584   ;;  %vm593_vm7 = vcmask 228352   ;;  %vm598_vm8 = vcmask 261120   ;;  %vm1057_vm9 = vcmask 293888  }
  0x12   : > { %s2128_s23 = scalar_lea.vmem %s2972_s8, %s1772_s20  ;;  %s2130_s24 = scalar_lea.vmem %s368_s19, %s1841_s13  ;;  %1883 = vmatpush3.msra.mxu0 %v1048_v17 }
  0x13   : > { %v2133_v0 = vld [vmem:[%s2130_s24] sm:$0xff]  ;;  %s363_s28 = scalar_lea.vmem %s2964_s0, %s1938_s14  ;;  %s373_s18 = scalar_lea.vmem %s2966_s2, %s1938_s14  ;;  %v2149_v2 = vld [vmem:[%s2130_s24 + $0x10] sm:$0xff]  ;;  %1884 = vmatprep.subr.mxu0 %v1047_v19 }
  0x14   : > { %439 = vrot.lane.b32.xlu0 %v2133_v0, %s2031_s12  ;;  %s2140_s15 = scalar_lea.vmem %s363_s28, %s1841_s13  ;;  %s2032_s19 = smov 8   ;;  %v2181_v7 = vld [vmem:[%s2130_s24 + $0x20] sm:$0xff]  ;;  %v2196_v10 = vld [vmem:[%s2130_s24 + $0x30] sm:$0xff]  ;;  %1885 = vmatpush3.msra.mxu0 %v1047_v19 }
  0x15   : > { %v2146_v1 = vld [vmem:[%s2140_s15 + $0x1] sm:$0xff]  ;;  %s2153_s20 = scalar_lea.vmem %s373_s18, %s1841_s13  ;;  %v2156_v3 = vld [vmem:[%s2140_s15 + $0x11] sm:$0xff]  ;;  %s378_s25 = scalar_lea.vmem %s2967_s3, %s1938_s14  ;;  %1886 = vmatprep.subr.mxu0 %v1046_v21 }
  0x16   : > { %455 = vrot.lane.b32.xlu1 %v2146_v1, %s2032_s19  ;;  %v2164_v4 = vld [vmem:[%s2153_s20] sm:$0xff]  ;;  %s2168_s26 = scalar_lea.vmem %s378_s25, %s1841_s13  ;;  %v2171_v5 = vld [vmem:[%s2153_s20 + $0x10] sm:$0xff]  ;;  %s2033_s28 = smov 12   ;;  %1887 = vmatpush3.msra.mxu0 %v1046_v21 }
  0x17   : > { %v2176_v6 = vld [vmem:[%s2168_s26] sm:$0xff]  ;;  %s2034_s13 = smov 16   ;;  %v2186_v8 = vld [vmem:[%s2168_s26 + $0x10] sm:$0xff]  ;;  %s2035_s14 = smov 20   ;;  %1888 = vmatprep.subr.mxu0 %v1045_v22 }
  0x18   : > { %441 = vrot.lane.b32.xlu0 %v2149_v2, %s2031_s12  ;;  %v2191_v9 = vld [vmem:[%s2153_s20 + $0x1] sm:$0xff]  ;;  %v2206_v12 = vld [vmem:[%s2153_s20 + $0x11] sm:$0xff]  ;;  %s2036_s16 = smov 24   ;;  %1889 = vmatpush3.msra.mxu0 %v1045_v22  ;;  %s2038_s18 = smov 32  }
  0x19   : > { %v2201_v11 = vld [vmem:[%s2140_s15 + $0x21] sm:$0xff]  ;;  %v2211_v13 = vld [vmem:[%s2140_s15 + $0x10] sm:$0xff] }
  0x1a   : > { %457 = vrot.lane.b32.xlu1 %v2156_v3, %s2032_s19  ;;  %v2216_v14 = vld [vmem:[%s2140_s15 + $0x31] sm:$0xff]  ;;  %v2224_v16 = vld [vmem:[%s2153_s20 + $0x20] sm:$0xff] }
  0x1b   : > { %v2232_v18 = vld [vmem:[%s2140_s15 + $0x20] sm:$0xff]  ;;  %v2242_v20 = vld [vmem:[%s2153_s20 + $0x30] sm:$0xff] }
  0x1c   : > { %471 = vrot.lane.b32.xlu0 %v2164_v4, %s2033_s28  ;;  %v2253_v23 = vld [vmem:[%s2168_s26 + $0x20] sm:$0xff]  ;;  %v2262_v24 = vld [vmem:[%s2168_s26 + $0x30] sm:$0xff] }
  0x1d   : > { %v2267_v25 = vld [vmem:[%s2153_s20 + $0x21] sm:$0xff]  ;;  %v2276_v26 = vld [vmem:[%s2153_s20 + $0x31] sm:$0xff] }
  0x1e   : > { %473 = vrot.lane.b32.xlu1 %v2171_v5, %s2033_s28  ;;  %v2281_v27 = vld [vmem:[%s2140_s15 + $0x30] sm:$0xff]  ;;  %v603_v28 = vld [vmem:[%s2130_s24 + $0x1] sm:$0xff] }
  0x1f   : > { %v2291_v29 = vld [vmem:[%s2140_s15 + $0x40] sm:$0xff]  ;;  %v2297_v30 = vld [vmem:[%s2130_s24 + $0x11] sm:$0xff] }
  0x20   : > { %487 = vrot.lane.b32.xlu0 %v2176_v6, %s2034_s13  ;;  %v2304_v31 = vld [vmem:[%s2130_s24 + $0x40] sm:$0xff]  ;;  %v2336_v35 = vld [vmem:[%s2168_s26 + $0x11] sm:$0xff] }
  0x21   : > { %v2315_v32 = vld [vmem:[%s2140_s15 + $0x41] sm:$0xff]  ;;  %v2343_v36 = vld [vmem:[%s2130_s24 + $0x31] sm:$0xff] }
  0x22   : > { %443 = vrot.lane.b32.xlu1 %v2181_v7, %s2031_s12  ;;  %v2324_v33 = vld [vmem:[%s2168_s26 + $0x1] sm:$0xff]  ;;  %v2373_v38 = vld [vmem:[%s2168_s26 + $0x31] sm:$0xff] }
  0x23   : > { %v2331_v34 = vld [vmem:[%s2130_s24 + $0x21] sm:$0xff] }
  0x24   : > { %489 = vrot.lane.b32.xlu0 %v2186_v8, %s2034_s13  ;;  %v2364_v37 = vld [vmem:[%s2168_s26 + $0x21] sm:$0xff] }
  0x25   : > { %v2406_v51 = vld [vmem:[%s2130_s24 + $0x41] sm:$0xff] }
  0x26   : > { %503 = vrot.lane.b32.xlu1 %v2191_v9, %s2035_s14  ;;  %v392_v56 = vld [vmem:[%s2140_s15] sm:$0xff] }
  0x28   : > { %445 = vrot.lane.b32.xlu0 %v2196_v10, %s2031_s12 }
  0x2a   : > { %459 = vrot.lane.b32.xlu1 %v2201_v11, %s2032_s19 }
  0x2c   : > { %505 = vrot.lane.b32.xlu0 %v2206_v12, %s2035_s14 }
  0x2e   : > { %519 = vrot.lane.b32.xlu1 %v2211_v13, %s2036_s16 }
  0x30   : > { %461 = vrot.lane.b32.xlu0 %v2216_v14, %s2032_s19 }
  0x32   : > { %475 = vrot.lane.b32.xlu1 %v2224_v16, %s2033_s28 }
  0x34   : > { %521 = vrot.lane.b32.xlu0 %v2232_v18, %s2036_s16 }
  0x36   : > { %535 = vrot.lane.b32.xlu1 %v2149_v2, %s2037_s22 }
  0x38   : > { %477 = vrot.lane.b32.xlu0 %v2242_v20, %s2033_s28 }
  0x3a   : > { %491 = vrot.lane.b32.xlu1 %v2253_v23, %s2034_s13 }
  0x3c   : > { %537 = vrot.lane.b32.xlu0 %v2181_v7, %s2037_s22 }
  0x3e   : > { %551 = vrot.lane.b32.xlu1 %v2156_v3, %s2038_s18 }
  0x40   : > { %493 = vrot.lane.b32.xlu0 %v2262_v24, %s2034_s13 }
  0x42   : > { %507 = vrot.lane.b32.xlu1 %v2267_v25, %s2035_s14 }
  0x44   : > { %553 = vrot.lane.b32.xlu0 %v2201_v11, %s2038_s18 }
  0x46   : > { %615 = vrot.lane.b32.xlu1 %v2146_v1, %s2031_s12 }
  0x48   : > { %509 = vrot.lane.b32.xlu0 %v2276_v26, %s2035_s14 }
  0x4a   : > { %523 = vrot.lane.b32.xlu1 %v2281_v27, %s2036_s16 }
  0x4c   : > { %617 = vrot.lane.b32.xlu0 %v2156_v3, %s2031_s12 }
  0x4e   : > { %631 = vrot.lane.b32.xlu1 %v603_v28, %s2032_s19 }
  0x50   : > { %525 = vrot.lane.b32.xlu0 %v2291_v29, %s2036_s16 }
  0x52   : > { %539 = vrot.lane.b32.xlu1 %v2196_v10, %s2037_s22 }
  0x54   : > { %633 = vrot.lane.b32.xlu0 %v2297_v30, %s2032_s19 }
  0x56   : > { %643 = vrot.lane.b32.xlu1 %v2176_v6, %s2033_s28 }
  0x58   : > { %541 = vrot.lane.b32.xlu0 %v2304_v31, %s2037_s22 }
  0x5a   : > { %555 = vrot.lane.b32.xlu1 %v2216_v14, %s2038_s18 }
  0x5c   : > { %645 = vrot.lane.b32.xlu0 %v2186_v8, %s2033_s28 }
  0x5e   : > { %655 = vrot.lane.b32.xlu1 %v2191_v9, %s2034_s13 }
  0x60   : > { %557 = vrot.lane.b32.xlu0 %v2315_v32, %s2038_s18 }
  0x62   : > { %619 = vrot.lane.b32.xlu1 %v2201_v11, %s2031_s12 }
  0x64   : > { %657 = vrot.lane.b32.xlu0 %v2206_v12, %s2034_s13 }
  0x66   : > { %671 = vrot.lane.b32.xlu1 %v2324_v33, %s2035_s14 }
  0x68   : > { %621 = vrot.lane.b32.xlu0 %v2216_v14, %s2031_s12 }
  0x6a   : > { %635 = vrot.lane.b32.xlu1 %v2331_v34, %s2032_s19 }
  0x6c   : > { %673 = vrot.lane.b32.xlu0 %v2336_v35, %s2035_s14 }
  0x6e   : > { %683 = vrot.lane.b32.xlu1 %v2149_v2, %s2036_s16 }
  0x70   : > { %637 = vrot.lane.b32.xlu0 %v2343_v36, %s2032_s19 }
  0x72   : > { %647 = vrot.lane.b32.xlu1 %v2253_v23, %s2033_s28 }
  0x74   : > { %685 = vrot.lane.b32.xlu0 %v2181_v7, %s2036_s16 }
  0x76   : > { %695 = vrot.lane.b32.xlu1 %v2156_v3, %s2037_s22 }
  0x78   : > { %649 = vrot.lane.b32.xlu0 %v2262_v24, %s2033_s28 }
  0x7a   : > { %659 = vrot.lane.b32.xlu1 %v2267_v25, %s2034_s13 }
  0x7c   : > { %697 = vrot.lane.b32.xlu0 %v2201_v11, %s2037_s22 }
  0x7e   : > { %711 = vrot.lane.b32.xlu1 %v2297_v30, %s2038_s18 }
  0x80   : > { %661 = vrot.lane.b32.xlu0 %v2276_v26, %s2034_s13 }
  0x82   : > { %675 = vrot.lane.b32.xlu1 %v2364_v37, %s2035_s14 }
  0x84   : > { %713 = vrot.lane.b32.xlu0 %v2331_v34, %s2038_s18 }
  0x86   : > { %769 = vrot.lane.b32.xlu1 %v2176_v6, %s2031_s12  ;;  %v440_v39 = vpop.permute.xlu0 %439 }
  0x87   : > { %v564_v58 = vsel %vm563_vm1, %v392_v56, %v440_v39 }
  0x88   : > { %v456_v40 = vpop.permute.xlu1 %455  ;;  %677 = vrot.lane.b32.xlu0 %v2373_v38, %s2035_s14 }
  0x89   : > { %v569_v61 = vsel %vm568_vm2, %v564_v58, %v456_v40 }
  0x8a   : > { %687 = vrot.lane.b32.xlu1 %v2196_v10, %s2036_s16  ;;  %v442_v41 = vpop.permute.xlu0 %441 }
  0x8b   : > { %v565_v15 = vsel %vm563_vm1, %v2211_v13, %v442_v41 }
  0x8c   : > { %v458_v42 = vpop.permute.xlu1 %457  ;;  %771 = vrot.lane.b32.xlu0 %v2186_v8, %s2031_s12 }
  0x8d   : > { %v570_v39 = vsel %vm568_vm2, %v565_v15, %v458_v42 }
  0x8e   : > { %781 = vrot.lane.b32.xlu1 %v2191_v9, %s2032_s19  ;;  %v472_v43 = vpop.permute.xlu0 %471 }
  0x8f   : > { %v574_v62 = vsel %vm573_vm3, %v569_v61, %v472_v43 }
  0x90   : > { %v474_v44 = vpop.permute.xlu1 %473  ;;  %689 = vrot.lane.b32.xlu0 %v2304_v31, %s2036_s16 }
  0x91   : > { %v575_v40 = vsel %vm573_vm3, %v570_v39, %v474_v44  ;;  %v1800_v39 = vld [vmem:[%s2153_s20 + $0x40] sm:$0xff] }
  0x92   : > { %699 = vrot.lane.b32.xlu1 %v2216_v14, %s2037_s22  ;;  %v488_v45 = vpop.permute.xlu0 %487 }
  0x93   : > { %v579_v1 = vsel %vm578_vm4, %v574_v62, %v488_v45 }
  0x94   : > { %v2389_v46 = vpop.permute.xlu1 %443  ;;  %783 = vrot.lane.b32.xlu0 %v2206_v12, %s2032_s19 }
  0x95   : > { %v566_v62 = vsel %vm563_vm1, %v2232_v18, %v2389_v46 }
  0x96   : > { %793 = vrot.lane.b32.xlu1 %v2211_v13, %s2033_s28  ;;  %v490_v47 = vpop.permute.xlu0 %489 }
  0x97   : > { %v580_v43 = vsel %vm578_vm4, %v575_v40, %v490_v47 }
  0x98   : > { %v504_v48 = vpop.permute.xlu1 %503  ;;  %701 = vrot.lane.b32.xlu0 %v2315_v32, %s2037_s22 }
  0x99   : > { %v584_v17 = vsel %vm583_vm5, %v579_v1, %v504_v48 }
  0x9a   : > { %715 = vrot.lane.b32.xlu1 %v2343_v36, %s2038_s18  ;;  %v2399_v49 = vpop.permute.xlu0 %445 }
  0x9c   : > { %v2401_v50 = vpop.permute.xlu1 %459  ;;  %795 = vrot.lane.b32.xlu0 %v2232_v18, %s2033_s28 }
  0x9d   : > { %v571_v15 = vsel %vm568_vm2, %v566_v62, %v2401_v50  ;;  %v567_v50 = vsel %vm563_vm1, %v2281_v27, %v2399_v49 }
  0x9e   : > { %805 = vrot.lane.b32.xlu1 %v2149_v2, %s2034_s13  ;;  %v506_v52 = vpop.permute.xlu0 %505 }
  0x9f   : > { %v585_v45 = vsel %vm583_vm5, %v580_v43, %v506_v52 }
  0xa0   : > { %v520_v53 = vpop.permute.xlu1 %519  ;;  %717 = vrot.lane.b32.xlu0 %v2406_v51, %s2038_s18 }
  0xa1   : > { %v589_v21 = vsel %vm588_vm6, %v584_v17, %v520_v53 }
  0xa2   : > { %773 = vrot.lane.b32.xlu1 %v2253_v23, %s2031_s12  ;;  %v2414_v54 = vpop.permute.xlu0 %461 }
  0xa4   : > { %v2416_v55 = vpop.permute.xlu1 %475  ;;  %807 = vrot.lane.b32.xlu0 %v2181_v7, %s2034_s13 }
  0xa5   : > { %v576_v17 = vsel %vm573_vm3, %v571_v15, %v2416_v55 }
  0xa6   : > { %817 = vrot.lane.b32.xlu1 %v2156_v3, %s2035_s14  ;;  %v522_v57 = vpop.permute.xlu0 %521 }
  0xa7   : > { %v590_v42 = vsel %vm588_vm6, %v585_v45, %v522_v57 }
  0xa8   : > { %v536_v59 = vpop.permute.xlu1 %535  ;;  %775 = vrot.lane.b32.xlu0 %v2262_v24, %s2031_s12 }
  0xa9   : > { %v594_v22 = vsel %vm593_vm7, %v589_v21, %v536_v59 }
  0xaa   : > { %785 = vrot.lane.b32.xlu1 %v2267_v25, %s2032_s19  ;;  %v2428_v60 = vpop.permute.xlu0 %477 }
  0xac   : > { %v492_v63 = vpop.permute.xlu1 %491  ;;  %819 = vrot.lane.b32.xlu0 %v2201_v11, %s2035_s14 }
  0xad   : > { %v581_v21 = vsel %vm578_vm4, %v576_v17, %v492_v63  ;;  %v572_v63 = vsel %vm568_vm2, %v567_v50, %v2414_v54 }
  0xae   : > { %833 = vrot.lane.b32.xlu1 %v2171_v5, %s2036_s16  ;;  %v538_v19 = vpop.permute.xlu0 %537 }
  0xaf   : > { %v595_v53 = vsel %vm593_vm7, %v590_v42, %v538_v19 }
  0xb0   : > { %v552_v28 = vpop.permute.xlu1 %551  ;;  %787 = vrot.lane.b32.xlu0 %v2276_v26, %s2032_s19 }
  0xb1   : > { %v599_v13 = vsel %vm598_vm8, %v594_v22, %v552_v28 }
  0xb2   : > { %797 = vrot.lane.b32.xlu1 %v2281_v27, %s2033_s28  ;;  %1890 = vmatprep.mubr.msk.f32.mxu0 %vm1057_vm9, %v599_v13  ;;  %v494_v41 = vpop.permute.xlu0 %493  ;;  %v577_v13 = vsel %vm573_vm3, %v572_v63, %v2428_v60 }
  0xb3   : > { %v582_v49 = vsel %vm578_vm4, %v577_v13, %v494_v41  ;;  %v2527_v41 = vld [vmem:[%s2168_s26 + $0x40] sm:$0xff] }
  0xb4   : > { %v508_v48 = vpop.permute.xlu1 %507  ;;  %835 = vrot.lane.b32.xlu0 %v2224_v16, %s2036_s16 }
  0xb5   : > { %v586_v18 = vsel %vm583_vm5, %v581_v21, %v508_v48 }
  0xb6   : > { %849 = vrot.lane.b32.xlu1 %v2186_v8, %s2037_s22  ;;  %v554_v44 = vpop.permute.xlu0 %553 }
  0xb7   : > { %v600_v56 = vsel %vm598_vm8, %v595_v53, %v554_v44 }
  0xb8   : > { %v2459_v58 = vpop.permute.xlu1 %615  ;;  %799 = vrot.lane.b32.xlu0 %v2291_v29, %s2033_s28  ;;  %1891 = vmatmul.mubr.msk.f32.vlgmr.msra.gmra.mxu0 %vm1057_vm9, %v600_v56 }
  0xba   : > { %809 = vrot.lane.b32.xlu1 %v2196_v10, %s2034_s13  ;;  %v510_v47 = vpop.permute.xlu0 %509 }
  0xbb   : > { %v587_v40 = vsel %vm583_vm5, %v582_v49, %v510_v47  ;;  %v2542_v47 = vld [vmem:[%s2153_s20 + $0x41] sm:$0xff] }
  0xbc   : > { %v524_v52 = vpop.permute.xlu1 %523  ;;  %851 = vrot.lane.b32.xlu0 %v2253_v23, %s2037_s22 }
  0xbd   : > { %v591_v46 = vsel %vm588_vm6, %v586_v18, %v524_v52 }
  0xbe   : > { %865 = vrot.lane.b32.xlu1 %v2206_v12, %s2038_s18  ;;  %v2470_v57 = vpop.permute.xlu0 %617 }
  0xc0   : > { %v2472_v59 = vpop.permute.xlu1 %631  ;;  %811 = vrot.lane.b32.xlu0 %v2304_v31, %s2034_s13 }
  0xc2   : > { %821 = vrot.lane.b32.xlu1 %v2216_v14, %s2035_s14  ;;  %v526_v29 = vpop.permute.xlu0 %525 }
  0xc3   : > { %v592_v54 = vsel %vm588_vm6, %v587_v40, %v526_v29 }
  0xc4   : > { %v540_v61 = vpop.permute.xlu1 %539  ;;  %867 = vrot.lane.b32.xlu0 %v2267_v25, %s2038_s18 }
  0xc5   : > { %v596_v55 = vsel %vm593_vm7, %v591_v46, %v540_v61 }
  0xc6   : > { %913 = vrot.lane.b32.xlu1 %v2191_v9, %s2031_s12  ;;  %v2485_v1 = vpop.permute.xlu0 %633 }
  0xc8   : > { %v644_v19 = vpop.permute.xlu1 %643  ;;  %823 = vrot.lane.b32.xlu0 %v2315_v32, %s2035_s14 }
  0xca   : > { %837 = vrot.lane.b32.xlu1 %v2242_v20, %s2036_s16  ;;  %v542_v9 = vpop.permute.xlu0 %541 }
  0xcb   : > { %v597_v45 = vsel %vm593_vm7, %v592_v54, %v542_v9 }
  0xcc   : > { %v556_v22 = vpop.permute.xlu1 %555  ;;  %915 = vrot.lane.b32.xlu0 %v2206_v12, %s2031_s12 }
  0xcd   : > { %v601_v28 = vsel %vm598_vm8, %v596_v55, %v556_v22 }
  0xce   : > { %925 = vrot.lane.b32.xlu1 %v2324_v33, %s2032_s19  ;;  %1893 = vmatprep.mubr.msk.f32.mxu0 %vm1057_vm9, %v601_v28  ;;  %v646_v27 = vpop.permute.xlu0 %645 }
  0xd0   : > { %v656_v43 = vpop.permute.xlu1 %655  ;;  %839 = vrot.lane.b32.xlu0 %v1800_v39, %s2036_s16 }
  0xd2   : > { %853 = vrot.lane.b32.xlu1 %v2262_v24, %s2037_s22  ;;  %v558_v60 = vpop.permute.xlu0 %557 }
  0xd3   : > { %v602_v33 = vsel %vm598_vm8, %v597_v45, %v558_v60 }
  0xd4   : > { %v2521_v48 = vpop.permute.xlu1 %619  ;;  %927 = vrot.lane.b32.xlu0 %v2336_v35, %s2032_s19  ;;  %1894 = vmatmul.mubr.msk.f32.gmra.mxu0 %vm1057_vm9, %v602_v33 }
  0xd6   : > { %937 = vrot.lane.b32.xlu1 %v2149_v2, %s2033_s28  ;;  %v658_v42 = vpop.permute.xlu0 %657 }
  0xd8   : > { %v672_v53 = vpop.permute.xlu1 %671  ;;  %855 = vrot.lane.b32.xlu0 %v2527_v41, %s2037_s22 }
  0xda   : > { %869 = vrot.lane.b32.xlu1 %v2276_v26, %s2038_s18  ;;  %v2535_v44 = vpop.permute.xlu0 %621 }
  0xdb   : > { %v726_v33 = vsel %vm563_vm1, %v2196_v10, %v2535_v44 }
  0xdc   : > { %v2537_v56 = vpop.permute.xlu1 %635  ;;  %939 = vrot.lane.b32.xlu0 %v2181_v7, %s2033_s28 }
  0xde   : > { %949 = vrot.lane.b32.xlu1 %v2156_v3, %s2034_s13  ;;  %v674_v52 = vpop.permute.xlu0 %673  ;;  %v723_v3 = vsel %vm563_vm1, %v2133_v0, %v2459_v58 }
  0xe0   : > { %v684_v29 = vpop.permute.xlu1 %683  ;;  %871 = vrot.lane.b32.xlu0 %v2542_v47, %s2038_s18 }
  0xe2   : > { %917 = vrot.lane.b32.xlu1 %v2267_v25, %s2031_s12  ;;  %v2550_v61 = vpop.permute.xlu0 %637 }
  0xe4   : > { %v648_v62 = vpop.permute.xlu1 %647  ;;  %951 = vrot.lane.b32.xlu0 %v2201_v11, %s2034_s13  ;;  %v727_v11 = vsel %vm568_vm2, %v723_v3, %v2472_v59  ;;  %v724_v59 = vsel %vm563_vm1, %v2149_v2, %v2470_v57 }
  0xe5   : > { %v731_v18 = vsel %vm573_vm3, %v727_v11, %v644_v19 }
  0xe6   : > { %961 = vrot.lane.b32.xlu1 %v2297_v30, %s2035_s14  ;;  %v686_v15 = vpop.permute.xlu0 %685  ;;  %v735_v9 = vsel %vm578_vm4, %v731_v18, %v656_v43 }
  0xe7   : > { %v739_v46 = vsel %vm583_vm5, %v735_v9, %v672_v53  ;;  %v730_v53 = vsel %vm568_vm2, %v726_v33, %v2550_v61 }
  0xe8   : > { %v696_v17 = vpop.permute.xlu1 %695  ;;  %919 = vrot.lane.b32.xlu0 %v2276_v26, %s2031_s12  ;;  %v743_v58 = vsel %vm588_vm6, %v739_v46, %v684_v29 }
  0xe9   : > { %v747_v19 = vsel %vm593_vm7, %v743_v58, %v696_v17 }
  0xea   : > { %929 = vrot.lane.b32.xlu1 %v2364_v37, %s2032_s19  ;;  %v2563_v21 = vpop.permute.xlu0 %649 }
  0xec   : > { %v660_v30 = vpop.permute.xlu1 %659  ;;  %963 = vrot.lane.b32.xlu0 %v2331_v34, %s2035_s14  ;;  %v728_v34 = vsel %vm568_vm2, %v724_v59, %v2485_v1 }
  0xed   : > { %v732_v22 = vsel %vm573_vm3, %v728_v34, %v646_v27 }
  0xee   : > { %973 = vrot.lane.b32.xlu1 %v2186_v8, %s2036_s16  ;;  %v698_v0 = vpop.permute.xlu0 %697  ;;  %v736_v2 = vsel %vm578_vm4, %v732_v22, %v658_v42 }
  0xef   : > { %v740_v57 = vsel %vm583_vm5, %v736_v2, %v674_v52  ;;  %v1814_v52 = vld [vmem:[%s2168_s26 + $0x41] sm:$0xff] }
  0xf0   : > { %v712_v50 = vpop.permute.xlu1 %711  ;;  %931 = vrot.lane.b32.xlu0 %v2373_v38, %s2032_s19  ;;  %v744_v1 = vsel %vm588_vm6, %v740_v57, %v686_v15 }
  0xf1   : > { %v751_v55 = vsel %vm598_vm8, %v747_v19, %v712_v50  ;;  %v748_v39 = vsel %vm593_vm7, %v744_v1, %v698_v0 }
  0xf2   : > { %941 = vrot.lane.b32.xlu1 %v2196_v10, %s2033_s28  ;;  %1896 = vmatprep.mubr.msk.f32.mxu0 %vm1057_vm9, %v751_v55  ;;  %v662_v63 = vpop.permute.xlu0 %661 }
  0xf4   : > { %v676_v28 = vpop.permute.xlu1 %675  ;;  %975 = vrot.lane.b32.xlu0 %v2253_v23, %s2036_s16 }
  0xf6   : > { %985 = vrot.lane.b32.xlu1 %v2206_v12, %s2037_s22  ;;  %v714_v13 = vpop.permute.xlu0 %713 }
  0xf7   : > { %v752_v27 = vsel %vm598_vm8, %v748_v39, %v714_v13 }
  0xf8   : > { %v770_v49 = vpop.permute.xlu1 %769  ;;  %943 = vrot.lane.b32.xlu0 %v2304_v31, %s2033_s28  ;;  %1897 = vmatmul.mubr.msk.f32.gmra.mxu0 %vm1057_vm9, %v752_v27 }
  0xf9   : > { %v877_v59 = vsel %vm563_vm1, %v2164_v4, %v770_v49 }
  0xfa   : > { %953 = vrot.lane.b32.xlu1 %v2216_v14, %s2034_s13  ;;  %v678_v40 = vpop.permute.xlu0 %677  ;;  %v725_v14 = vsel %vm563_vm1, %v2181_v7, %v2521_v48 }
  0xfc   : > { %v688_v43 = vpop.permute.xlu1 %687  ;;  %987 = vrot.lane.b32.xlu0 %v2267_v25, %s2037_s22 }
  0xfe   : > { %1001 = vrot.lane.b32.xlu1 %v2336_v35, %s2038_s18  ;;  %v772_v12 = vpop.permute.xlu0 %771  ;;  %v729_v35 = vsel %vm568_vm2, %v725_v14, %v2537_v56 }
 0x100   : > { %v782_v54 = vpop.permute.xlu1 %781  ;;  %955 = vrot.lane.b32.xlu0 %v2315_v32, %s2034_s13  ;;  %v733_v32 = vsel %vm573_vm3, %v729_v35, %v648_v62 }
 0x101   : > { %v881_v50 = vsel %vm568_vm2, %v877_v59, %v782_v54 }
 0x102   : > { %965 = vrot.lane.b32.xlu1 %v2343_v36, %s2035_s14  ;;  %v690_v31 = vpop.permute.xlu0 %689  ;;  %v737_v36 = vsel %vm578_vm4, %v733_v32, %v660_v30 }
 0x104   : > { %v700_v45 = vpop.permute.xlu1 %699  ;;  %1003 = vrot.lane.b32.xlu0 %v2364_v37, %s2038_s18  ;;  %v741_v37 = vsel %vm583_vm5, %v737_v36, %v676_v28  ;;  %v878_v28 = vsel %vm563_vm1, %v2171_v5, %v772_v12 }
 0x106   : > { %967 = vrot.lane.b32.xlu1 %v2406_v51, %s2035_s14  ;;  %v784_v25 = vpop.permute.xlu0 %783  ;;  %v745_v51 = vsel %vm588_vm6, %v741_v37, %v688_v43 }
 0x107   : > { %v749_v48 = vsel %vm593_vm7, %v745_v51, %v700_v45  ;;  %v882_v4 = vsel %vm568_vm2, %v878_v28, %v784_v25 }
 0x108   : > { %v794_v60 = vpop.permute.xlu1 %793  ;;  %977 = vrot.lane.b32.xlu0 %v2262_v24, %s2036_s16 }
 0x109   : > { %v885_v34 = vsel %vm573_vm3, %v881_v50, %v794_v60 }
 0x10a   : > { %979 = vrot.lane.b32.xlu1 %v2527_v41, %s2036_s16  ;;  %v702_v7 = vpop.permute.xlu0 %701  ;;  %v734_v41 = vsel %vm573_vm3, %v730_v53, %v2563_v21 }
 0x10b   : > { %v738_v44 = vsel %vm578_vm4, %v734_v41, %v662_v63 }
 0x10c   : > { %v716_v42 = vpop.permute.xlu1 %715  ;;  %989 = vrot.lane.b32.xlu0 %v2276_v26, %s2037_s22  ;;  %v742_v29 = vsel %vm583_vm5, %v738_v44, %v678_v40 }
 0x10d   : > { %v753_v56 = vsel %vm598_vm8, %v749_v48, %v716_v42  ;;  %v746_v61 = vsel %vm588_vm6, %v742_v29, %v690_v31 }
 0x10e   : > { %991 = vrot.lane.b32.xlu1 %v2542_v47, %s2037_s22  ;;  %1899 = vmatprep.mubr.msk.f32.mxu0 %vm1057_vm9, %v753_v56  ;;  %v796_v10 = vpop.permute.xlu0 %795  ;;  %v750_v62 = vsel %vm593_vm7, %v746_v61, %v702_v7 }
 0x10f   : > { %v886_v27 = vsel %vm573_vm3, %v882_v4, %v796_v10 }
 0x110   : > { %v806_v26 = vpop.permute.xlu1 %805  ;;  %1005 = vrot.lane.b32.xlu0 %v2373_v38, %s2038_s18 }
 0x111   : > { %v889_v22 = vsel %vm578_vm4, %v885_v34, %v806_v26 }
 0x112   : > { %1007 = vrot.lane.b32.xlu1 %v1814_v52, %s2038_s18  ;;  %v718_v15 = vpop.permute.xlu0 %717 }
 0x113   : > { %v754_v47 = vsel %vm598_vm8, %v750_v62, %v718_v15 }
 0x114   : > { %v774_v17 = vpop.permute.xlu1 %773  ;;  %1900 = vmatmul.mubr.msk.f32.gmra.mxu0 %vm1057_vm9, %v754_v47 }
 0x115   : > { %v879_v7 = vsel %vm563_vm1, %v2224_v16, %v774_v17 }
 0x116   : > { %v808_v3 = vpop.permute.xlu0 %807 }
 0x117   : > { %v890_v40 = vsel %vm578_vm4, %v886_v27, %v808_v3 }
 0x118   : > { %v818_v21 = vpop.permute.xlu1 %817 }
 0x119   : > { %v893_v63 = vsel %vm583_vm5, %v889_v22, %v818_v21 }
 0x11a   : > { %v776_v11 = vpop.permute.xlu0 %775 }
 0x11b   : > { %v880_v44 = vsel %vm563_vm1, %v2242_v20, %v776_v11 }
 0x11c   : > { %v786_v18 = vpop.permute.xlu1 %785 }
 0x11d   : > { %v883_v33 = vsel %vm568_vm2, %v879_v7, %v786_v18 }
 0x11e   : > { %v820_v30 = vpop.permute.xlu0 %819 }
 0x11f   : > { %v894_v43 = vsel %vm583_vm5, %v890_v40, %v820_v30 }
 0x120   : > { %v834_v9 = vpop.permute.xlu1 %833 }
 0x121   : > { %v897_v57 = vsel %vm588_vm6, %v893_v63, %v834_v9 }
 0x122   : > { %v788_v46 = vpop.permute.xlu0 %787 }
 0x123   : > { %v884_v16 = vsel %vm568_vm2, %v880_v44, %v788_v46 }
 0x124   : > { %v798_v38 = vpop.permute.xlu1 %797 }
 0x125   : > { %v887_v48 = vsel %vm573_vm3, %v883_v33, %v798_v38 }
 0x126   : > { %v836_v0 = vpop.permute.xlu0 %835 }
 0x127   : > { %v898_v31 = vsel %vm588_vm6, %v894_v43, %v836_v0 }
 0x128   : > { %v850_v58 = vpop.permute.xlu1 %849 }
 0x129   : > { %v901_v1 = vsel %vm593_vm7, %v897_v57, %v850_v58 }
 0x12a   : > { %v800_v19 = vpop.permute.xlu0 %799 }
 0x12b   : > { %v888_v61 = vsel %vm573_vm3, %v884_v16, %v800_v19 }
 0x12c   : > { %v810_v55 = vpop.permute.xlu1 %809 }
 0x12d   : > { %v891_v53 = vsel %vm578_vm4, %v887_v48, %v810_v55 }
 0x12e   : > { %v852_v2 = vpop.permute.xlu0 %851 }
 0x12f   : > { %v902_v5 = vsel %vm593_vm7, %v898_v31, %v852_v2 }
 0x130   : > { %v866_v39 = vpop.permute.xlu1 %865 }
 0x131   : > { %v905_v13 = vsel %vm598_vm8, %v901_v1, %v866_v39 }
 0x132   : > { %1902 = vmatprep.mubr.msk.f32.mxu0 %vm1057_vm9, %v905_v13  ;;  %v812_v49 = vpop.permute.xlu0 %811 }
 0x133   : > { %v892_v15 = vsel %vm578_vm4, %v888_v61, %v812_v49 }
 0x134   : > { %v822_v54 = vpop.permute.xlu1 %821 }
 0x135   : > { %v895_v56 = vsel %vm583_vm5, %v891_v53, %v822_v54 }
 0x136   : > { %v868_v12 = vpop.permute.xlu0 %867 }
 0x137   : > { %v906_v45 = vsel %vm598_vm8, %v902_v5, %v868_v12 }
 0x138   : > { %v914_v14 = vpop.permute.xlu1 %913  ;;  %1903 = vmatmul.mubr.msk.f32.gmra.mxu0 %vm1057_vm9, %v906_v45 }
 0x139   : > { %v1013_v55 = vsel %vm563_vm1, %v2176_v6, %v914_v14 }
 0x13a   : > { %v824_v25 = vpop.permute.xlu0 %823 }
 0x13b   : > { %v896_v47 = vsel %vm583_vm5, %v892_v15, %v824_v25  ;;  %v2712_v25 = vld [vmem:[%s2969_s5] ss:$0 sm:$0xff] }
 0x13c   : > { %v838_v35 = vpop.permute.xlu1 %837 }
 0x13d   : > { %v899_v10 = vsel %vm588_vm6, %v895_v56, %v838_v35 }
 0x13e   : > { %v916_v32 = vpop.permute.xlu0 %915 }
 0x13f   : > { %v1014_v13 = vsel %vm563_vm1, %v2186_v8, %v916_v32 }
 0x140   : > { %v926_v60 = vpop.permute.xlu1 %925 }
 0x141   : > { %v1017_v63 = vsel %vm568_vm2, %v1013_v55, %v926_v60 }
 0x142   : > { %v840_v36 = vpop.permute.xlu0 %839 }
 0x143   : > { %v900_v3 = vsel %vm588_vm6, %v896_v47, %v840_v36 }
 0x144   : > { %v854_v37 = vpop.permute.xlu1 %853 }
 0x145   : > { %v903_v52 = vsel %vm593_vm7, %v899_v10, %v854_v37 }
 0x146   : > { %v928_v51 = vpop.permute.xlu0 %927 }
 0x147   : > { %v1018_v6 = vsel %vm568_vm2, %v1014_v13, %v928_v51 }
 0x148   : > { %v938_v42 = vpop.permute.xlu1 %937 }
 0x149   : > { %v1021_v2 = vsel %vm573_vm3, %v1017_v63, %v938_v42 }
 0x14a   : > { %v856_v41 = vpop.permute.xlu0 %855 }
 0x14b   : > { %v904_v20 = vsel %vm593_vm7, %v900_v3, %v856_v41 }
 0x14c   : > { %v870_v29 = vpop.permute.xlu1 %869 }
 0x14d   : > { %v907_v26 = vsel %vm598_vm8, %v903_v52, %v870_v29 }
 0x14e   : > { %1905 = vmatprep.mubr.msk.f32.mxu0 %vm1057_vm9, %v907_v26  ;;  %v940_v62 = vpop.permute.xlu0 %939 }
 0x14f   : > { %v1022_v43 = vsel %vm573_vm3, %v1018_v6, %v940_v62 }
 0x150   : > { %v950_v17 = vpop.permute.xlu1 %949 }
 0x151   : > { %v1025_v28 = vsel %vm578_vm4, %v1021_v2, %v950_v17 }
 0x152   : > { %v872_v21 = vpop.permute.xlu0 %871 }
 0x153   : > { %v908_v11 = vsel %vm598_vm8, %v904_v20, %v872_v21 }
 0x154   : > { %v918_v18 = vpop.permute.xlu1 %917  ;;  %1906 = vmatmul.mubr.msk.f32.gmra.mxu0 %vm1057_vm9, %v908_v11 }
 0x155   : > { %v1015_v48 = vsel %vm563_vm1, %v2253_v23, %v918_v18 }
 0x156   : > { %v952_v30 = vpop.permute.xlu0 %951 }
 0x157   : > { %v1026_v31 = vsel %vm578_vm4, %v1022_v43, %v952_v30 }
 0x158   : > { %v962_v9 = vpop.permute.xlu1 %961 }
 0x159   : > { %v1029_v1 = vsel %vm583_vm5, %v1025_v28, %v962_v9 }
 0x15a   : > { %v920_v46 = vpop.permute.xlu0 %919 }
 0x15b   : > { %v1016_v10 = vsel %vm563_vm1, %v2262_v24, %v920_v46 }
 0x15c   : > { %v930_v38 = vpop.permute.xlu1 %929 }
 0x15d   : > { %v1019_v53 = vsel %vm568_vm2, %v1015_v48, %v930_v38 }
 0x15e   : > { %v964_v0 = vpop.permute.xlu0 %963 }
 0x15f   : > { %v1030_v5 = vsel %vm583_vm5, %v1026_v31, %v964_v0 }
 0x160   : > { %v974_v58 = vpop.permute.xlu1 %973 }
 0x161   : > { %v1033_v4 = vsel %vm588_vm6, %v1029_v1, %v974_v58 }
 0x162   : > { %v932_v59 = vpop.permute.xlu0 %931 }
 0x163   : > { %v1020_v29 = vsel %vm568_vm2, %v1016_v10, %v932_v59 }
 0x164   : > { %v942_v19 = vpop.permute.xlu1 %941 }
 0x165   : > { %v1023_v44 = vsel %vm573_vm3, %v1019_v53, %v942_v19 }
 0x166   : > { %v976_v50 = vpop.permute.xlu0 %975 }
 0x167   : > { %v1034_v45 = vsel %vm588_vm6, %v1030_v5, %v976_v50 }
 0x168   : > { %v986_v34 = vpop.permute.xlu1 %985 }
 0x169   : > { %v1037_v27 = vsel %vm593_vm7, %v1033_v4, %v986_v34 }
 0x16a   : > { %v944_v22 = vpop.permute.xlu0 %943 }
 0x16b   : > { %v1024_v23 = vsel %vm573_vm3, %v1020_v29, %v944_v22 }
 0x16c   : > { %v954_v57 = vpop.permute.xlu1 %953 }
 0x16d   : > { %v1027_v16 = vsel %vm578_vm4, %v1023_v44, %v954_v57 }
 0x16e   : > { %v988_v39 = vpop.permute.xlu0 %987 }
 0x16f   : > { %v1038_v8 = vsel %vm593_vm7, %v1034_v45, %v988_v39 }
 0x170   : > { %v1002_v49 = vpop.permute.xlu1 %1001 }
 0x171   : > { %v1041_v40 = vsel %vm598_vm8, %v1037_v27, %v1002_v49 }
 0x172   : > { %1908 = vmatprep.mubr.msk.f32.mxu0 %vm1057_vm9, %v1041_v40  ;;  %v956_v54 = vpop.permute.xlu0 %955 }
 0x173   : > { %v1028_v15 = vsel %vm578_vm4, %v1024_v23, %v956_v54 }
 0x174   : > { %v966_v12 = vpop.permute.xlu1 %965 }
 0x175   : > { %v1031_v61 = vsel %vm583_vm5, %v1027_v16, %v966_v12 }
 0x176   : > { %v1004_v14 = vpop.permute.xlu0 %1003 }
 0x177   : > { %v1042_v35 = vsel %vm598_vm8, %v1038_v8, %v1004_v14 }
 0x178   : > { %v968_v32 = vpop.permute.xlu1 %967  ;;  %v1892_v60 = vpop.f32.mrf.mxu0  ;;  %1909 = vmatmul.mubr.msk.f32.gmra.mxu0 %vm1057_vm9, %v1042_v35 }
 0x179   : > { %v1182_v36 = vadd.f32 %v1892_v60, %v2712_v25  ;;  %v1032_v24 = vsel %vm583_vm5, %v1028_v15, %v968_v32 }
 0x17a   : > { %v978_v37 = vpop.permute.xlu0 %977  ;;  %v1176_v7 = vpop.f32.mrf.mxu0 }
 0x17b   : > { %vm1256_vm10 = vcmp.ge.f32.partialorder %v1182_v36, 0.0  ;;  %v1272_v51 = vmul.f32 0.1, %v1182_v36  ;;  %v1177_v33 = vadd.f32 %v2712_v25, %v1176_v7  ;;  %v1035_v47 = vsel %vm588_vm6, %v1031_v61, %v978_v37 }
 0x17c   : > { %v980_v42 = vpop.permute.xlu1 %979 }
 0x17d   : > { %v2721_v56 = vsel %vm1256_vm10, %v1182_v36, %v1272_v51  ;;  %vm1255_vm11 = vcmp.ge.f32.partialorder %v1177_v33, 0.0  ;;  %v1271_v41 = vmul.f32 0.1, %v1177_v33  ;;  %v1036_v20 = vsel %vm588_vm6, %v1032_v24, %v980_v42 }
 0x17e   : > { %v990_v52 = vpop.permute.xlu0 %989 }
 0x17f   : > { %v2728_v26 = vsel %vm1255_vm11, %v1177_v33, %v1271_v41  ;;  %v1039_v17 = vsel %vm593_vm7, %v1035_v47, %v990_v52 }
 0x180   : > { %v992_v62 = vpop.permute.xlu1 %991 }
 0x181   : > { %v1040_v11 = vsel %vm593_vm7, %v1036_v20, %v992_v62 }
 0x182   : > { %v1006_v3 = vpop.permute.xlu0 %1005 }
 0x183   : > { %v1043_v21 = vsel %vm598_vm8, %v1039_v17, %v1006_v3 }
 0x184   : > { %v1008_v18 = vpop.permute.xlu1 %1007  ;;  %1911 = vmatprep.mubr.msk.f32.mxu0 %vm1057_vm9, %v1043_v21 }
 0x185   : > { %v1044_v30 = vsel %vm598_vm8, %v1040_v11, %v1008_v18 }
 0x186   : > { %1912 = vmatmul.mubr.msk.f32.gmra.mxu0 %vm1057_vm9, %v1044_v30 }
 0x194   : > { %v1895_v9 = vpop.f32.mrf.mxu0 }
 0x195   : > { %v1192_v46 = vadd.f32 %v1895_v9, %v2712_v25 }
 0x196   : > { %v1186_v38 = vpop.f32.mrf.mxu0 }
 0x197   : > { %vm1258_vm12 = vcmp.ge.f32.partialorder %v1192_v46, 0.0  ;;  %v1274_v0 = vmul.f32 0.1, %v1192_v46  ;;  %v1187_v58 = vadd.f32 %v2712_v25, %v1186_v38 }
 0x199   : > { %v2744_v59 = vsel %vm1258_vm12, %v1192_v46, %v1274_v0  ;;  %vm1257_vm13 = vcmp.ge.f32.partialorder %v1187_v58, 0.0  ;;  %v1273_v19 = vmul.f32 0.1, %v1187_v58 }
 0x19b   : > { %v2746_v50 = vsel %vm1257_vm13, %v1187_v58, %v1273_v19 }
 0x1b8   : > { %v1898_v34 = vpop.f32.mrf.mxu0 }
 0x1b9   : > { %v1202_v55 = vadd.f32 %v1898_v34, %v2712_v25 }
 0x1ba   : > { %v1196_v22 = vpop.f32.mrf.mxu0 }
 0x1bb   : > { %vm1260_vm14 = vcmp.ge.f32.partialorder %v1202_v55, 0.0  ;;  %v1276_v63 = vmul.f32 0.1, %v1202_v55  ;;  %v1197_v2 = vadd.f32 %v2712_v25, %v1196_v22 }
 0x1bd   : > { %v2750_v57 = vsel %vm1260_vm14, %v1202_v55, %v1276_v63  ;;  %vm1259_vm15 = vcmp.ge.f32.partialorder %v1197_v2, 0.0  ;;  %v1275_v28 = vmul.f32 0.1, %v1197_v2 }
 0x1bf   : > { %v2752_v1 = vsel %vm1259_vm15, %v1197_v2, %v1275_v28 }
 0x1d4   : > { %v1901_v39 = vpop.f32.mrf.mxu0 }
 0x1d5   : > { %v1212_v4 = vadd.f32 %v1901_v39, %v2712_v25 }
 0x1d6   : > { %v1206_v13 = vpop.f32.mrf.mxu0 }
 0x1d7   : > { %vm1262_vm0 = vcmp.ge.f32.partialorder %v1212_v4, 0.0  ;;  %v1278_v27 = vmul.f32 0.1, %v1212_v4  ;;  %v1207_v49 = vadd.f32 %v2712_v25, %v1206_v13 }
 0x1d9   : > { %v2756_v6 = vsel %vm1262_vm0, %v1212_v4, %v1278_v27  ;;  %vm1261_vm1 = vcmp.ge.f32.partialorder %v1207_v49, 0.0  ;;  %v1277_v40 = vmul.f32 0.1, %v1207_v49 }
 0x1db   : > { %v2758_v43 = vsel %vm1261_vm1, %v1207_v49, %v1277_v40 }
 0x1f8   : > { %v1904_v54 = vpop.f32.mrf.mxu0 }
 0x1f9   : > { %v1222_v31 = vadd.f32 %v1904_v54, %v2712_v25 }
 0x1fa   : > { %v1216_v5 = vpop.f32.mrf.mxu0 }
 0x1fb   : > { %vm1264_vm3 = vcmp.ge.f32.partialorder %v1222_v31, 0.0  ;;  %v1280_v12 = vmul.f32 0.1, %v1222_v31  ;;  %v1217_v45 = vadd.f32 %v2712_v25, %v1216_v5 }
 0x1fd   : > { %v2762_v8 = vsel %vm1264_vm3, %v1222_v31, %v1280_v12  ;;  %vm1263_vm5 = vcmp.ge.f32.partialorder %v1217_v45, 0.0  ;;  %v1279_v14 = vmul.f32 0.1, %v1217_v45 }
 0x1ff   : > { %v2764_v35 = vsel %vm1263_vm5, %v1217_v45, %v1279_v14 }
 0x214   : > { %v1907_v32 = vpop.f32.mrf.mxu0 }
 0x215   : > { %v1232_v60 = vadd.f32 %v1907_v32, %v2712_v25 }
 0x216   : > { %v1226_v36 = vpop.f32.mrf.mxu0 }
 0x217   : > { %vm1266_vm7 = vcmp.ge.f32.partialorder %v1232_v60, 0.0  ;;  %v1282_v37 = vmul.f32 0.1, %v1232_v60  ;;  %v1227_v7 = vadd.f32 %v2712_v25, %v1226_v36 }
 0x219   : > { %v2768_v51 = vsel %vm1266_vm7, %v1232_v60, %v1282_v37  ;;  %vm1265_vm9 = vcmp.ge.f32.partialorder %v1227_v7, 0.0  ;;  %v1281_v33 = vmul.f32 0.1, %v1227_v7 }
 0x21b   : > { %v2770_v48 = vsel %vm1265_vm9, %v1227_v7, %v1281_v33 }
 0x238   : > { %v1910_v42 = vpop.f32.mrf.mxu0 }
 0x239   : > { %v1242_v53 = vadd.f32 %v1910_v42, %v2712_v25 }
 0x23a   : > { %v1236_v41 = vpop.f32.mrf.mxu0 }
 0x23b   : > { %vm1268_vm10 = vcmp.ge.f32.partialorder %v1242_v53, 0.0  ;;  %v1284_v10 = vmul.f32 0.1, %v1242_v53  ;;  %v1237_v44 = vadd.f32 %v2712_v25, %v1236_v41 }
 0x23d   : > { %v2774_v52 = vsel %vm1268_vm10, %v1242_v53, %v1284_v10  ;;  %vm1267_vm11 = vcmp.ge.f32.partialorder %v1237_v44, 0.0  ;;  %v1283_v29 = vmul.f32 0.1, %v1237_v44 }
 0x23f   : > { %v2776_v16 = vsel %vm1267_vm11, %v1237_v44, %v1283_v29 }
 0x246   : > { %v1913_v23 = vpop.f32.mrf.mxu0 }
 0x247   : > { %v1252_v61 = vadd.f32 %v1913_v23, %v2712_v25 }
 0x248   : > { %v1246_v62 = vpop.f32.mrf.mxu0 }
 0x249   : > { %vm1270_vm12 = vcmp.ge.f32.partialorder %v1252_v61, 0.0  ;;  %v1286_v15 = vmul.f32 0.1, %v1252_v61  ;;  %v1247_v47 = vadd.f32 %v2712_v25, %v1246_v62  ;;  %1306 = sbr.rel (%p1833_p7) target bundleno = 591 (0x24f), region = 56 }
 0x24b   : > { %v2780_v24 = vsel %vm1270_vm12, %v1252_v61, %v1286_v15  ;;  %vm1269_vm13 = vcmp.ge.f32.partialorder %v1247_v47, 0.0  ;;  %v1285_v17 = vmul.f32 0.1, %v1247_v47 }
 0x24d   : > { %v2782_v3 = vsel %vm1269_vm13, %v1247_v47, %v1285_v17 }
 0x24e   : > { %1307 = vst.msk [vmem:[#allocation2] sm:$0xff] %vm568_vm2, %v2764_v35  ;;  %1308 = vst.msk [vmem:[#allocation3] sm:$0xff] %vm568_vm2, %v2776_v16 }
 0x24f PF: > { %v1335_v25 = vrot.slane %v2750_v57, 7  ;;  %v1334_v11 = vrot.slane %v2752_v1, 7  ;;  %vm1325_vm14 = vcmask 1040384   ;;  %v1507_v38 = vld [vmem:[%s2970_s6 + $0x40] sm:$0xff]  ;;  %s2039_s20 = smov 40   ;;  %v1318_v0 = vrot.slane %v2776_v16, 7 }
 0x250   : > { %1914 = vmatprep.subr.mxu1 %v1507_v38  ;;  %v1506_v58 = vld [vmem:[%s2970_s6 + $0x38] sm:$0xff]  ;;  %v1336_v19 = vrot.slane %v2758_v43, 7  ;;  %v1504_v34 = vld [vmem:[%s2970_s6 + $0x28] sm:$0xff]  ;;  %s2040_s17 = smov 48   ;;  %v1319_v22 = vrot.slane %v2774_v52, 7  ;;  %v1503_v63 = vld [vmem:[%s2970_s6 + $0x20] sm:$0xff] }
 0x251   : > { %v1343_v30 = vsel %vm1325_vm14, %v2750_v57, %v1335_v25  ;;  %v1342_v9 = vsel %vm1325_vm14, %v2752_v1, %v1334_v11  ;;  %1915 = vmatpush3.msra.mxu1 %v1507_v38  ;;  %v1502_v2 = vld [vmem:[%s2970_s6 + $0x18] sm:$0xff]  ;;  %v1337_v28 = vrot.slane %v2756_v6, 7  ;;  %s2041_s28 = smov 56   ;;  %v1500_v4 = vld [vmem:[%s2970_s6 + $0x8] sm:$0xff]  ;;  %v1499_v13 = vld [vmem:[%s2970_s6] sm:$0xff]  ;;  %s2042_s25 = smov 64  }
 0x252   : > { %1916 = vmatprep.subr.mxu1 %v1506_v58  ;;  %v1344_v55 = vsel %vm1325_vm14, %v2758_v43, %v1336_v19  ;;  %v1320_v27 = vrot.slane %v2782_v3, 7  ;;  %vm1479_vm15 = vcmask 326656   ;;  %vm1484_vm0 = vcmask 392192  }
 0x253   : > { %1917 = vmatpush3.msra.mxu1 %v1506_v58  ;;  %v1345_v39 = vsel %vm1325_vm14, %v2756_v6, %v1337_v28  ;;  %vm1489_vm1 = vcmask 457728   ;;  %vm1494_vm3 = vcmask 523264   ;;  %vm1515_vm5 = vcmask 588800  }
 0x254   : > { %v1329_v40 = vsel %vm1325_vm14, %v2782_v3, %v1320_v27 }
 0x255   : > { %v1310_v20 = vld [vmem:[#allocation3] sm:$0xff]  ;;  %v1309_v21 = vld [vmem:[#allocation2] sm:$0xff] }
 0x256   : > { %1366 = vrot.lane.b32.xlu1 %v1310_v20, %s2034_s13  ;;  %1312 = vst.msk [vmem:[#allocation3] sm:$0xff] %vm568_vm2, %v2780_v24  ;;  %1354 = vrot.lane.b32.xlu0 %v1309_v21, %s2032_s19  ;;  %1311 = vst.msk [vmem:[#allocation2] sm:$0xff] %vm568_vm2, %v2768_v51  ;;  %v1317_v18 = vrot.slane %v1310_v20, 7 }
 0x258   : > { %v2806_v46 = vsel %vm1325_vm14, %v1310_v20, %v1317_v18 }
 0x25a   : > { %1368 = vrot.lane.b32.xlu1 %v2776_v16, %s2034_s13  ;;  %1356 = vrot.lane.b32.xlu0 %v2764_v35, %s2032_s19 }
 0x25e   : > { %1384 = vrot.lane.b32.xlu1 %v1343_v30, %s2036_s16  ;;  %1382 = vrot.lane.b32.xlu0 %v1342_v9, %s2036_s16 }
 0x262   : > { %1358 = vrot.lane.b32.xlu1 %v2762_v8, %s2032_s19  ;;  %1398 = vrot.lane.b32.xlu0 %v2728_v26, %s2038_s18  ;;  %v1505_v26 = vld [vmem:[%s2970_s6 + $0x30] sm:$0xff] }
 0x263   : > { %1918 = vmatprep.subr.mxu1 %v1505_v26 }
 0x264   : > { %1919 = vmatpush3.msra.mxu1 %v1505_v26 }
 0x265   : > { %1920 = vmatprep.subr.mxu1 %v1504_v34 }
 0x266   : > { %1410 = vrot.lane.b32.xlu1 %v2752_v1, %s2039_s20  ;;  %1400 = vrot.lane.b32.xlu0 %v2721_v56, %s2038_s18  ;;  %v2834_v56 = vsel %vm1325_vm14, %v2776_v16, %v1318_v0  ;;  %v1501_v1 = vld [vmem:[%s2970_s6 + $0x10] sm:$0xff] }
 0x267   : > { %1921 = vmatpush3.msra.mxu1 %v1504_v34 }
 0x268   : > { %1922 = vmatprep.subr.mxu1 %v1503_v63 }
 0x269   : > { %1923 = vmatpush3.msra.mxu1 %v1503_v63 }
 0x26a   : > { %1370 = vrot.lane.b32.xlu1 %v2774_v52, %s2034_s13  ;;  %1360 = vrot.lane.b32.xlu0 %v2770_v48, %s2032_s19 }
 0x26b   : > { %1924 = vmatprep.subr.mxu1 %v1502_v2 }
 0x26c   : > { %1925 = vmatpush3.msra.mxu1 %v1502_v2 }
 0x26d   : > { %1926 = vmatprep.subr.mxu1 %v1501_v1 }
 0x26e   : > { %1426 = vrot.lane.b32.xlu1 %v2834_v56, %s2040_s17  ;;  %1412 = vrot.lane.b32.xlu0 %v2750_v57, %s2039_s20  ;;  %v2858_v57 = vsel %vm1325_vm14, %v2774_v52, %v1319_v22 }
 0x26f   : > { %1927 = vmatpush3.msra.mxu1 %v1501_v1 }
 0x270   : > { %1928 = vmatprep.subr.mxu1 %v1500_v4 }
 0x271   : > { %1929 = vmatpush3.msra.mxu1 %v1500_v4 }
 0x272   : > { %1386 = vrot.lane.b32.xlu1 %v1344_v55, %s2036_s16  ;;  %1372 = vrot.lane.b32.xlu0 %v2782_v3, %s2034_s13 }
 0x273   : > { %1930 = vmatprep.subr.mxu1 %v1499_v13 }
 0x274   : > { %1931 = vmatpush3.msra.mxu1 %v1499_v13 }
 0x276   : > { %1439 = vrot.lane.b32.xlu1 %v2764_v35, %s2041_s28  ;;  %1428 = vrot.lane.b32.xlu0 %v2858_v57, %s2040_s17 }
 0x27a   : > { %1402 = vrot.lane.b32.xlu1 %v2746_v50, %s2038_s18  ;;  %1388 = vrot.lane.b32.xlu0 %v1345_v39, %s2036_s16  ;;  %v1347_v50 = vrot.slane %v2780_v24, 7 }
 0x27c   : > { %v1349_v49 = vsel %vm1325_vm14, %v2780_v24, %v1347_v50 }
 0x27e   : > { %1451 = vrot.lane.b32.xlu1 %v2776_v16, %s2042_s25  ;;  %1441 = vrot.lane.b32.xlu0 %v2762_v8, %s2041_s28 }
 0x282   : > { %1414 = vrot.lane.b32.xlu1 %v2758_v43, %s2039_s20  ;;  %1404 = vrot.lane.b32.xlu0 %v2744_v59, %s2038_s18 }
 0x286   : > { %1416 = vrot.lane.b32.xlu1 %v2756_v6, %s2039_s20  ;;  %1453 = vrot.lane.b32.xlu0 %v2774_v52, %s2042_s25 }
 0x28a   : > { %1432 = vrot.lane.b32.xlu1 %v1349_v49, %s2040_s17  ;;  %1430 = vrot.lane.b32.xlu0 %v1329_v40, %s2040_s17 }
 0x28e   : > { %1445 = vrot.lane.b32.xlu1 %v2768_v51, %s2041_s28  ;;  %1443 = vrot.lane.b32.xlu0 %v2770_v48, %s2041_s28 }
 0x292   : > { %1457 = vrot.lane.b32.xlu1 %v2780_v24, %s2042_s25  ;;  %1455 = vrot.lane.b32.xlu0 %v2782_v3, %s2042_s25 }
 0x2c8   : > { %v1367_v59 = vpop.permute.xlu1 %1366  ;;  %v1355_v6 = vpop.permute.xlu0 %1354 }
 0x2c9   : > { %v1463_v51 = vsel %vm568_vm2, %v2806_v46, %v1355_v6 }
 0x2ca   : > { %v1467_v42 = vsel %vm578_vm4, %v1463_v51, %v1367_v59  ;;  %v1834_v59 = vld [vmem:[%s2971_s7] ss:$0 sm:$0xff] }
 0x2cc   : > { %v1369_v43 = vpop.permute.xlu1 %1368  ;;  %v1357_v54 = vpop.permute.xlu0 %1356 }
 0x2cd   : > { %v1464_v16 = vsel %vm568_vm2, %v2834_v56, %v1357_v54 }
 0x2ce   : > { %v1468_v47 = vsel %vm578_vm4, %v1464_v16, %v1369_v43 }
 0x2d0   : > { %v1385_v31 = vpop.permute.xlu1 %1384  ;;  %v1383_v5 = vpop.permute.xlu0 %1382 }
 0x2d1   : > { %v1471_v53 = vsel %vm588_vm6, %v1467_v42, %v1383_v5  ;;  %v1472_v24 = vsel %vm588_vm6, %v1468_v47, %v1385_v31 }
 0x2d4   : > { %v1359_v12 = vpop.permute.xlu1 %1358  ;;  %v1399_v45 = vpop.permute.xlu0 %1398 }
 0x2d5   : > { %v1475_v44 = vsel %vm598_vm8, %v1471_v53, %v1399_v45  ;;  %v1465_v0 = vsel %vm568_vm2, %v2858_v57, %v1359_v12 }
 0x2d8   : > { %v1411_v8 = vpop.permute.xlu1 %1410  ;;  %v1401_v14 = vpop.permute.xlu0 %1400 }
 0x2d9   : > { %v1480_v52 = vsel %vm1479_vm15, %v1475_v44, %v1411_v8  ;;  %v1476_v20 = vsel %vm598_vm8, %v1472_v24, %v1401_v14 }
 0x2dc   : > { %v1371_v35 = vpop.permute.xlu1 %1370  ;;  %v1361_v32 = vpop.permute.xlu0 %1360 }
 0x2dd   : > { %v1466_v58 = vsel %vm568_vm2, %v1329_v40, %v1361_v32  ;;  %v1469_v26 = vsel %vm578_vm4, %v1465_v0, %v1371_v35 }
 0x2e0   : > { %v1427_v60 = vpop.permute.xlu1 %1426  ;;  %v1413_v36 = vpop.permute.xlu0 %1412 }
 0x2e1   : > { %v1485_v29 = vsel %vm1484_vm0, %v1480_v52, %v1427_v60  ;;  %v1481_v21 = vsel %vm1479_vm15, %v1476_v20, %v1413_v36 }
 0x2e4   : > { %v1387_v37 = vpop.permute.xlu1 %1386  ;;  %v1373_v7 = vpop.permute.xlu0 %1372 }
 0x2e5   : > { %v1470_v56 = vsel %vm578_vm4, %v1466_v58, %v1373_v7  ;;  %v1473_v19 = vsel %vm588_vm6, %v1469_v26, %v1387_v37 }
 0x2e8   : > { %v1440_v33 = vpop.permute.xlu1 %1439  ;;  %v1429_v48 = vpop.permute.xlu0 %1428 }
 0x2e9   : > { %v1490_v23 = vsel %vm1489_vm1, %v1485_v29, %v1440_v33  ;;  %v1486_v25 = vsel %vm1484_vm0, %v1481_v21, %v1429_v48 }
 0x2ec   : > { %v1403_v41 = vpop.permute.xlu1 %1402  ;;  %v1389_v10 = vpop.permute.xlu0 %1388 }
 0x2ed   : > { %v1474_v34 = vsel %vm588_vm6, %v1470_v56, %v1389_v10  ;;  %v1477_v63 = vsel %vm598_vm8, %v1473_v19, %v1403_v41 }
 0x2f0   : > { %v1452_v61 = vpop.permute.xlu1 %1451  ;;  %v1442_v62 = vpop.permute.xlu0 %1441 }
 0x2f1   : > { %v1495_v15 = vsel %vm1494_vm3, %v1490_v23, %v1452_v61  ;;  %v1491_v11 = vsel %vm1489_vm1, %v1486_v25, %v1442_v62 }
 0x2f2   : > { %1932 = vmatprep.mubr.msk.f32.mxu1 %vm1515_vm5, %v1495_v15 }
 0x2f4   : > { %v1415_v17 = vpop.permute.xlu1 %1414  ;;  %v1405_v3 = vpop.permute.xlu0 %1404 }
 0x2f5   : > { %v1478_v2 = vsel %vm598_vm8, %v1474_v34, %v1405_v3  ;;  %v1482_v28 = vsel %vm1479_vm15, %v1477_v63, %v1415_v17 }
 0x2f8   : > { %v1417_v18 = vpop.permute.xlu1 %1416  ;;  %v1454_v30 = vpop.permute.xlu0 %1453 }
 0x2f9   : > { %v1496_v9 = vsel %vm1494_vm3, %v1491_v11, %v1454_v30  ;;  %v1483_v57 = vsel %vm1479_vm15, %v1478_v2, %v1417_v18 }
 0x2fa   : > { %1933 = vmatmul.mubr.msk.f32.vlgmr.msra.gmra.mxu1 %vm1515_vm5, %v1496_v9 }
 0x2fc   : > { %v1433_v46 = vpop.permute.xlu1 %1432  ;;  %v1431_v38 = vpop.permute.xlu0 %1430 }
 0x2fd   : > { %v1488_v1 = vsel %vm1484_vm0, %v1483_v57, %v1433_v46  ;;  %v1487_v39 = vsel %vm1484_vm0, %v1482_v28, %v1431_v38 }
 0x300   : > { %v1446_v55 = vpop.permute.xlu1 %1445  ;;  %v1444_v22 = vpop.permute.xlu0 %1443 }
 0x301   : > { %v1493_v4 = vsel %vm1489_vm1, %v1488_v1, %v1446_v55  ;;  %v1492_v13 = vsel %vm1489_vm1, %v1487_v39, %v1444_v22 }
 0x304   : > { %v1458_v50 = vpop.permute.xlu1 %1457  ;;  %v1456_v27 = vpop.permute.xlu0 %1455 }
 0x305   : > { %v1498_v49 = vsel %vm1494_vm3, %v1493_v4, %v1458_v50  ;;  %v1497_v40 = vsel %vm1494_vm3, %v1492_v13, %v1456_v27 }
 0x306   : > { %1935 = vmatprep.mubr.msk.f32.mxu1 %vm1515_vm5, %v1497_v40 }
 0x307   : > { %1936 = vmatmul.mubr.msk.f32.gmra.mxu1 %vm1515_vm5, %v1498_v49 }
 0x3ba   : > { %v1934_v6 = vpop.f32.mrf.mxu1 }
 0x3bb   : > { %v1600_v43 = vadd.f32 %v1934_v6, %v1834_v59 }
 0x3bc   : > { %v1594_v54 = vpop.f32.mrf.mxu1 }
 0x3bd   : > { %1614 = vst.msk [vmem:[%s2128_s23 + $0x8] sm:$0xff] %vm568_vm2, %v1600_v43  ;;  %v1595_v31 = vadd.f32 %v1834_v59, %v1594_v54 }
 0x3bf   : > { %1613 = vst.msk [vmem:[%s2128_s23] sm:$0xff] %vm568_vm2, %v1595_v31 }
 0x3c7   : > { %v1937_v5 = vpop.f32.mrf.mxu1 }
 0x3c8   : > { %v1610_v12 = vadd.f32 %v1937_v5, %v1834_v59 }
 0x3c9   : > { %v1604_v45 = vpop.f32.mrf.mxu1 }
 0x3ca   : > { %1616 = vst.msk [vmem:[%s2128_s23 + $0x18] sm:$0xff] %vm568_vm2, %v1610_v12  ;;  %v1605_v8 = vadd.f32 %v1834_v59, %v1604_v45 }
 0x3cc   : > { %1615 = vst.msk [vmem:[%s2128_s23 + $0x10] sm:$0xff] %vm568_vm2, %v1605_v8 }
 0x3cd PF: > { %s18_s9 = sadd.s32 1, %s2029_s9   ;;  %s2973_s27 = smov %s2021_s29 }
 0x3ce   : > { %p15_p8 = scmp.ge.s32.totalorder %s18_s9, 6   ;;  %s2974_s28 = smov %s2025_s30 }
 0x3cf   : > { %s2975_s29 = smov %s2978_s10  ;;  %s2976_s30 = smov %s2982_s11 }
 0x3d0   :  { %17 = sbr.rel (!%p15_p8) target bundleno = 3 (0x3), region = 103 }

</bundles_post_ra>
